<compile_context>
chip_gen: v6e
topology: v6e:2x2x1
jax: 0.10.0
libtpu: 0.0.40
codegen_flags: <defaults>
</compile_context>

<pallas_src>
import functools

import jax
import jax.numpy as jnp
from jax import lax
from jax.experimental import pallas as pl
from jax.experimental.pallas import tpu as pltpu


def _softshrink(x, theta):
    # 3-op identity (max, min, sub) instead of sign*max(|x|-theta, 0):
    # shortest VPU chain on the serial path between dependent matmuls.
    return x - jnp.clip(x, -theta, theta)


def _lista_kernel(y_ref, wt_ref, s_ref, out_ref, *, theta, max_iter, out_cols):
    cdt = wt_ref.dtype                       # compute dtype (bf16 by default)
    y = y_ref[...].astype(cdt)               # in-kernel cast: no extra HBM pass
    wt = wt_ref[...]                         # (n, m_pad) == W^T, VMEM resident

    # W^T(Y) is reused by every refinement iteration -> compute once, keep f32.
    wy = jnp.dot(y, wt, preferred_element_type=jnp.float32)   # (tb, m_pad) f32
    x = _softshrink(wy, theta)

    if max_iter > 1:
        s = s_ref[...]                       # (m_pad, m_pad) == S^T, resident
        tb = wy.shape[0]
        # Split the batch tile in two independent refinement chains so the
        # scheduler can overlap MXU work on one half with the softshrink +
        # bf16 cast (VPU) of the other half.
        n_sub = 2 if (tb >= 16 and tb % 16 == 0) else 1
        h = tb // n_sub
        wys = tuple(wy[i * h:(i + 1) * h] for i in range(n_sub))
        xs = tuple(x[i * h:(i + 1) * h] for i in range(n_sub))

        def step(xs_):
            sxs = tuple(
                jnp.dot(xh.astype(cdt), s, preferred_element_type=jnp.float32)
                for xh in xs_)
            return tuple(_softshrink(wyh + sxh, theta)
                         for wyh, sxh in zip(wys, sxs))

        if max_iter <= 8:
            for _ in range(max_iter):        # small static count: full unroll
                xs = step(xs)
        else:
            # Deep recurrences: bound instruction-stream size and live ranges.
            xs = lax.fori_loop(0, max_iter, lambda _, c: step(c), xs, unroll=2)

        x = jnp.concatenate(xs, axis=0) if n_sub > 1 else xs[0]
        # NOTE(v5e): if profiling shows the S matmul bound by RHS pushes, S
        # (m_pad=128 is one 128x128 MXU tile) could be held stationary via
        # pltpu.matmul_push_rhs / matmul_acc_lhs / matmul_pop across iterations.

    if out_cols != x.shape[1]:
        x = x[:, :out_cols]
    out_ref[...] = x.astype(out_ref.dtype)


def _round_up(x, mult):
    return ((x + mult - 1) // mult) * mult


def _feature_align(d):
    # 256-alignment fills the v6e/v7x 2x256x256 MXU; keep 128 for small dims
    # where extra padding is pure wasted flops (and matches the v5e 128x128 MXU).
    return 128 if d <= 128 else _round_up(d, 256)


def lista_forward(Y, W, S, theta, max_iter, *, block_b=None,
                  compute_dtype=jnp.bfloat16, out_dtype=None):
    """LISTA forward. Y: (B, n), W: (m, n), S: (m, m) -> X: (B, m).

    `out_dtype` defaults to Y.dtype (module-faithful); pass jnp.bfloat16 to
    halve output HBM writeback when the caller tolerates it.  For large
    max_iter / ill-conditioned dictionaries use compute_dtype=jnp.float32.
    """
    B, n = Y.shape
    m = W.shape[0]
    assert W.shape == (m, n) and S.shape == (m, m)
    out_dtype = Y.dtype if out_dtype is None else out_dtype

    w_item = jnp.dtype(compute_dtype).itemsize
    y_item = jnp.dtype(Y.dtype).itemsize
    o_item = jnp.dtype(out_dtype).itemsize

    m_pad = _feature_align(m)

    # --- VMEM capacity (128 MiB on v5e/v6e, 64 MiB per TC on v7x) ------------
    try:
        vmem_cap = int(pltpu.get_tpu_info().vmem_capacity_bytes)
    except Exception:  # capacity query only; fall back to the smallest part
        vmem_cap = 64 * 2**20

    def vmem_need(tb_):
        weights = (n * m_pad + m_pad * m_pad) * w_item     # resident, 1 buffer
        y_io = 2 * tb_ * n * y_item                        # double-buffered Y tiles
        o_io = 2 * tb_ * m * o_item                        # double-buffered out tiles
        tmp = 8 * tb_ * m_pad * 4                          # f32 wy/x/sx + casts
        return weights + y_io + o_io + tmp

    # --- batch tile: fill the MXU rows (>=256, prefer 512), shrink only if
    #     VMEM demands it, and expose >=2 grid steps for the 2 v7x TCs --------
    if block_b is None:
        tb = 512 if vmem_need(512) <= int(0.6 * vmem_cap) else 256
    else:
        tb = max(int(block_b), 8)
    tb = min(_round_up(tb, 8), _round_up(B, 8))
    while tb > 64 and vmem_need(tb) > int(0.7 * vmem_cap):
        tb = _round_up(tb // 2, 8)
    if block_b is None and pl.cdiv(B, tb) == 1 and B >= 512:
        tb = _round_up(pl.cdiv(B, 2), 8)                   # 2 tiles -> 2 TCs
    num_tiles = pl.cdiv(B, tb)

    # Weights are tiny vs Y: transpose/cast/pad them host-side once.  Y itself
    # is streamed untouched (no host-side pad or astype pass over the batch).
    Wt = jnp.pad(W.T.astype(compute_dtype), ((0, 0), (0, m_pad - m)))
    St = jnp.pad(S.T.astype(compute_dtype), ((0, m_pad - m), (0, m_pad - m)))

    kernel = functools.partial(_lista_kernel, theta=float(theta),
                               max_iter=int(max_iter), out_cols=m)

    n_refine = int(max_iter) if int(max_iter) > 1 else 0
    cost = pl.CostEstimate(
        flops=2 * num_tiles * tb * m_pad * (n + n_refine * m_pad),
        transcendentals=0,
        bytes_accessed=B * n * y_item + (n + m_pad) * m_pad * w_item
        + B * m * o_item,
    )

    # Realistic budget with headroom; never over ~85% of physical VMEM
    # (leaves room for Mosaic internal scratch, esp. on the 64 MiB v7x part).
    vmem_limit = int(min(int(0.85 * vmem_cap),
                         max(2 * vmem_need(tb), 32 * 2**20)))

    # TODO(synk): for m_pad >= ~4k (S alone >= 32 MiB bf16) the whole-S-resident
    # design stops fitting v7x VMEM; switch to an inner pltpu.emit_pipeline over
    # (m_pad, 256)-column blocks of S per refinement iteration.

    out = pl.pallas_call(
        kernel,
        out_shape=jax.ShapeDtypeStruct((B, m), out_dtype),
        grid=(num_tiles,),
        in_specs=[
            pl.BlockSpec((tb, n), lambda i: (i, 0)),            # Y tile (pipelined)
            pl.BlockSpec(memory_space=pltpu.MemorySpace.VMEM),  # W^T resident (1 buf)
            pl.BlockSpec(memory_space=pltpu.MemorySpace.VMEM),  # S^T resident (1 buf)
        ],
        out_specs=pl.BlockSpec((tb, m), lambda i: (i, 0)),
        compiler_params=pltpu.CompilerParams(
            dimension_semantics=("parallel",),   # independent batch tiles
            vmem_limit_bytes=vmem_limit,
        ),
        cost_estimate=cost,
    )(Y, Wt, St)
    return out


def lista_reference(Y, W, S, theta, max_iter):
    shrink = lambda v: jnp.sign(v) * jnp.maximum(jnp.abs(v) - theta, 0.0)
    X = shrink(Y @ W.T)
    if max_iter == 1:
        return X
    for _ in range(max_iter):
        X = shrink(Y @ W.T + X @ S.T)
    return X


if __name__ == "__main__":
    key = jax.random.PRNGKey(0)
    k_a, k_y = jax.random.split(key)

    # Module-consistent small shapes: n = measurement dim, m = sparse dim.
    n, m, batch = 16, 32, 512
    max_iter = 5
    theta = 0.01

    # Dictionary A (n, m) and the weights_init() parameterisation.
    A = jax.random.normal(k_a, (n, m), dtype=jnp.float32)
    L = float(jnp.linalg.norm(A, ord=2) ** 2)                   # Lipschitz of A^T A
    W = (1.0 / L) * A.T                                         # (m, n)
    S = jnp.eye(m, dtype=jnp.float32) - (1.0 / L) * (A.T @ A)   # (m, m)

    Y = jax.random.normal(k_y, (batch, n), dtype=jnp.float32)
    X_ref = lista_reference(Y, W, S, theta, max_iter)
    assert bool(jnp.any(jnp.abs(X_ref) > 0))                    # non-trivial output

    # f32 compute path (accuracy fallback).
    X_f32 = jax.block_until_ready(
        lista_forward(Y, W, S, theta, max_iter, compute_dtype=jnp.float32))
    assert X_f32.shape == (batch, m)
    err_f32 = float(jnp.max(jnp.abs(X_f32 - X_ref)))
    assert jnp.allclose(X_f32, X_ref, atol=1e-3, rtol=1e-3), err_f32

    # Default path: bf16 MXU operands, f32 accumulation.
    X_bf16 = jax.block_until_ready(lista_forward(Y, W, S, theta, max_iter))
    assert X_bf16.shape == (batch, m)
    err_bf16 = float(jnp.max(jnp.abs(X_bf16 - X_ref)))
    assert jnp.allclose(X_bf16, X_ref, atol=2e-2, rtol=2e-2), err_bf16

    print("KERNEL_OK")
</pallas_src>

<mosaic_0001>
module attributes {stable_mosaic.version = 11 : i64} {
  func.func @_lista_kernel(%arg0: i32, %arg1: memref<256x16xf32, #tpu.memory_space<vmem>>, %arg2: memref<16x128xf32, #tpu.memory_space<vmem>>, %arg3: memref<128x128xf32, #tpu.memory_space<vmem>>, %arg4: memref<256x32xf32, #tpu.memory_space<vmem>>) attributes {dimension_semantics = [#tpu.dimension_semantics<parallel>], iteration_bounds = array<i64: 2>, scalar_prefetch = 0 : i64, scratch_operands = 0 : i64, tpu.core_type = #tpu.core_type<tc>, window_params = [{transform_indices = @transform_0, window_bounds = array<i64: 256, 16>}, {pipeline_mode = #tpu.pipeline_mode<synchronous>, transform_indices = @transform_1, window_bounds = array<i64: 16, 128>}, {pipeline_mode = #tpu.pipeline_mode<synchronous>, transform_indices = @transform_2, window_bounds = array<i64: 128, 128>}, {transform_indices = @transform_3, window_bounds = array<i64: 256, 32>}]} {
    %c0 = arith.constant 0 : index
    %c0_0 = arith.constant 0 : index
    %0 = vector.load %arg1[%c0, %c0_0] : memref<256x16xf32, #tpu.memory_space<vmem>>, vector<256x16xf32>
    %c0_1 = arith.constant 0 : index
    %c0_2 = arith.constant 0 : index
    %1 = vector.load %arg2[%c0_1, %c0_2] : memref<16x128xf32, #tpu.memory_space<vmem>>, vector<16x128xf32>
    %cst = arith.constant dense<0.000000e+00> : vector<256x128xf32>
    %2 = tpu.matmul %0, %1, %cst {dimension_numbers = #tpu.dot_dimension_numbers<[1], [0], [0], [1], [0, 0, 1, 1], [], []>} : vector<256x16xf32>, vector<16x128xf32>, vector<256x128xf32> -> vector<256x128xf32>
    %cst_3 = arith.constant -0.00999999977 : f32
    %cst_4 = arith.constant 0.00999999977 : f32
    %3 = vector.broadcast %cst_3 : f32 to vector<256x128xf32>
    %4 = arith.maximumf %3, %2 : vector<256x128xf32>
    %5 = vector.broadcast %cst_4 : f32 to vector<256x128xf32>
    %6 = arith.minimumf %5, %4 : vector<256x128xf32>
    %7 = arith.subf %2, %6 : vector<256x128xf32>
    %c0_5 = arith.constant 0 : index
    %c0_6 = arith.constant 0 : index
    %8 = vector.load %arg3[%c0_5, %c0_6] : memref<128x128xf32, #tpu.memory_space<vmem>>, vector<128x128xf32>
    %9 = vector.extract_strided_slice %2 {offsets = [0, 0], sizes = [128, 128], strides = [1, 1]} : vector<256x128xf32> to vector<128x128xf32>
    %10 = vector.extract_strided_slice %2 {offsets = [128, 0], sizes = [128, 128], strides = [1, 1]} : vector<256x128xf32> to vector<128x128xf32>
    %11 = vector.extract_strided_slice %7 {offsets = [0, 0], sizes = [128, 128], strides = [1, 1]} : vector<256x128xf32> to vector<128x128xf32>
    %12 = vector.extract_strided_slice %7 {offsets = [128, 0], sizes = [128, 128], strides = [1, 1]} : vector<256x128xf32> to vector<128x128xf32>
    %cst_7 = arith.constant dense<0.000000e+00> : vector<128x128xf32>
    %13 = tpu.matmul %11, %8, %cst_7 {dimension_numbers = #tpu.dot_dimension_numbers<[1], [0], [0], [1], [0, 0, 1, 1], [], []>} : vector<128x128xf32>, vector<128x128xf32>, vector<128x128xf32> -> vector<128x128xf32>
    %cst_8 = arith.constant dense<0.000000e+00> : vector<128x128xf32>
    %14 = tpu.matmul %12, %8, %cst_8 {dimension_numbers = #tpu.dot_dimension_numbers<[1], [0], [0], [1], [0, 0, 1, 1], [], []>} : vector<128x128xf32>, vector<128x128xf32>, vector<128x128xf32> -> vector<128x128xf32>
    %15 = arith.addf %9, %13 : vector<128x128xf32>
    %cst_9 = arith.constant -0.00999999977 : f32
    %cst_10 = arith.constant 0.00999999977 : f32
    %16 = vector.broadcast %cst_9 : f32 to vector<128x128xf32>
    %17 = arith.maximumf %16, %15 : vector<128x128xf32>
    %18 = vector.broadcast %cst_10 : f32 to vector<128x128xf32>
    %19 = arith.minimumf %18, %17 : vector<128x128xf32>
    %20 = arith.subf %15, %19 : vector<128x128xf32>
    %21 = arith.addf %10, %14 : vector<128x128xf32>
    %cst_11 = arith.constant -0.00999999977 : f32
    %cst_12 = arith.constant 0.00999999977 : f32
    %22 = vector.broadcast %cst_11 : f32 to vector<128x128xf32>
    %23 = arith.maximumf %22, %21 : vector<128x128xf32>
    %24 = vector.broadcast %cst_12 : f32 to vector<128x128xf32>
    %25 = arith.minimumf %24, %23 : vector<128x128xf32>
    %26 = arith.subf %21, %25 : vector<128x128xf32>
    %cst_13 = arith.constant dense<0.000000e+00> : vector<128x128xf32>
    %27 = tpu.matmul %20, %8, %cst_13 {dimension_numbers = #tpu.dot_dimension_numbers<[1], [0], [0], [1], [0, 0, 1, 1], [], []>} : vector<128x128xf32>, vector<128x128xf32>, vector<128x128xf32> -> vector<128x128xf32>
    %cst_14 = arith.constant dense<0.000000e+00> : vector<128x128xf32>
    %28 = tpu.matmul %26, %8, %cst_14 {dimension_numbers = #tpu.dot_dimension_numbers<[1], [0], [0], [1], [0, 0, 1, 1], [], []>} : vector<128x128xf32>, vector<128x128xf32>, vector<128x128xf32> -> vector<128x128xf32>
    %29 = arith.addf %9, %27 : vector<128x128xf32>
    %cst_15 = arith.constant -0.00999999977 : f32
    %cst_16 = arith.constant 0.00999999977 : f32
    %30 = vector.broadcast %cst_15 : f32 to vector<128x128xf32>
    %31 = arith.maximumf %30, %29 : vector<128x128xf32>
    %32 = vector.broadcast %cst_16 : f32 to vector<128x128xf32>
    %33 = arith.minimumf %32, %31 : vector<128x128xf32>
    %34 = arith.subf %29, %33 : vector<128x128xf32>
    %35 = arith.addf %10, %28 : vector<128x128xf32>
    %cst_17 = arith.constant -0.00999999977 : f32
    %cst_18 = arith.constant 0.00999999977 : f32
    %36 = vector.broadcast %cst_17 : f32 to vector<128x128xf32>
    %37 = arith.maximumf %36, %35 : vector<128x128xf32>
    %38 = vector.broadcast %cst_18 : f32 to vector<128x128xf32>
    %39 = arith.minimumf %38, %37 : vector<128x128xf32>
    %40 = arith.subf %35, %39 : vector<128x128xf32>
    %cst_19 = arith.constant dense<0.000000e+00> : vector<128x128xf32>
    %41 = tpu.matmul %34, %8, %cst_19 {dimension_numbers = #tpu.dot_dimension_numbers<[1], [0], [0], [1], [0, 0, 1, 1], [], []>} : vector<128x128xf32>, vector<128x128xf32>, vector<128x128xf32> -> vector<128x128xf32>
    %cst_20 = arith.constant dense<0.000000e+00> : vector<128x128xf32>
    %42 = tpu.matmul %40, %8, %cst_20 {dimension_numbers = #tpu.dot_dimension_numbers<[1], [0], [0], [1], [0, 0, 1, 1], [], []>} : vector<128x128xf32>, vector<128x128xf32>, vector<128x128xf32> -> vector<128x128xf32>
    %43 = arith.addf %9, %41 : vector<128x128xf32>
    %cst_21 = arith.constant -0.00999999977 : f32
    %cst_22 = arith.constant 0.00999999977 : f32
    %44 = vector.broadcast %cst_21 : f32 to vector<128x128xf32>
    %45 = arith.maximumf %44, %43 : vector<128x128xf32>
    %46 = vector.broadcast %cst_22 : f32 to vector<128x128xf32>
    %47 = arith.minimumf %46, %45 : vector<128x128xf32>
    %48 = arith.subf %43, %47 : vector<128x128xf32>
    %49 = arith.addf %10, %42 : vector<128x128xf32>
    %cst_23 = arith.constant -0.00999999977 : f32
    %cst_24 = arith.constant 0.00999999977 : f32
    %50 = vector.broadcast %cst_23 : f32 to vector<128x128xf32>
    %51 = arith.maximumf %50, %49 : vector<128x128xf32>
    %52 = vector.broadcast %cst_24 : f32 to vector<128x128xf32>
    %53 = arith.minimumf %52, %51 : vector<128x128xf32>
    %54 = arith.subf %49, %53 : vector<128x128xf32>
    %cst_25 = arith.constant dense<0.000000e+00> : vector<128x128xf32>
    %55 = tpu.matmul %48, %8, %cst_25 {dimension_numbers = #tpu.dot_dimension_numbers<[1], [0], [0], [1], [0, 0, 1, 1], [], []>} : vector<128x128xf32>, vector<128x128xf32>, vector<128x128xf32> -> vector<128x128xf32>
    %cst_26 = arith.constant dense<0.000000e+00> : vector<128x128xf32>
    %56 = tpu.matmul %54, %8, %cst_26 {dimension_numbers = #tpu.dot_dimension_numbers<[1], [0], [0], [1], [0, 0, 1, 1], [], []>} : vector<128x128xf32>, vector<128x128xf32>, vector<128x128xf32> -> vector<128x128xf32>
    %57 = arith.addf %9, %55 : vector<128x128xf32>
    %cst_27 = arith.constant -0.00999999977 : f32
    %cst_28 = arith.constant 0.00999999977 : f32
    %58 = vector.broadcast %cst_27 : f32 to vector<128x128xf32>
    %59 = arith.maximumf %58, %57 : vector<128x128xf32>
    %60 = vector.broadcast %cst_28 : f32 to vector<128x128xf32>
    %61 = arith.minimumf %60, %59 : vector<128x128xf32>
    %62 = arith.subf %57, %61 : vector<128x128xf32>
    %63 = arith.addf %10, %56 : vector<128x128xf32>
    %cst_29 = arith.constant -0.00999999977 : f32
    %cst_30 = arith.constant 0.00999999977 : f32
    %64 = vector.broadcast %cst_29 : f32 to vector<128x128xf32>
    %65 = arith.maximumf %64, %63 : vector<128x128xf32>
    %66 = vector.broadcast %cst_30 : f32 to vector<128x128xf32>
    %67 = arith.minimumf %66, %65 : vector<128x128xf32>
    %68 = arith.subf %63, %67 : vector<128x128xf32>
    %cst_31 = arith.constant dense<0.000000e+00> : vector<128x128xf32>
    %69 = tpu.matmul %62, %8, %cst_31 {dimension_numbers = #tpu.dot_dimension_numbers<[1], [0], [0], [1], [0, 0, 1, 1], [], []>} : vector<128x128xf32>, vector<128x128xf32>, vector<128x128xf32> -> vector<128x128xf32>
    %cst_32 = arith.constant dense<0.000000e+00> : vector<128x128xf32>
    %70 = tpu.matmul %68, %8, %cst_32 {dimension_numbers = #tpu.dot_dimension_numbers<[1], [0], [0], [1], [0, 0, 1, 1], [], []>} : vector<128x128xf32>, vector<128x128xf32>, vector<128x128xf32> -> vector<128x128xf32>
    %71 = arith.addf %9, %69 : vector<128x128xf32>
    %cst_33 = arith.constant -0.00999999977 : f32
    %cst_34 = arith.constant 0.00999999977 : f32
    %72 = vector.broadcast %cst_33 : f32 to vector<128x128xf32>
    %73 = arith.maximumf %72, %71 : vector<128x128xf32>
    %74 = vector.broadcast %cst_34 : f32 to vector<128x128xf32>
    %75 = arith.minimumf %74, %73 : vector<128x128xf32>
    %76 = arith.subf %71, %75 : vector<128x128xf32>
    %77 = arith.addf %10, %70 : vector<128x128xf32>
    %cst_35 = arith.constant -0.00999999977 : f32
    %cst_36 = arith.constant 0.00999999977 : f32
    %78 = vector.broadcast %cst_35 : f32 to vector<128x128xf32>
    %79 = arith.maximumf %78, %77 : vector<128x128xf32>
    %80 = vector.broadcast %cst_36 : f32 to vector<128x128xf32>
    %81 = arith.minimumf %80, %79 : vector<128x128xf32>
    %82 = arith.subf %77, %81 : vector<128x128xf32>
    %83 = tpu.concatenate %76, %82 in 0 : vector<128x128xf32>, vector<128x128xf32> -> vector<256x128xf32>
    %84 = vector.extract_strided_slice %83 {offsets = [0, 0], sizes = [256, 32], strides = [1, 1]} : vector<256x128xf32> to vector<256x32xf32>
    %c0_37 = arith.constant 0 : index
    %c0_38 = arith.constant 0 : index
    %85 = vector.load %arg4[%c0_37, %c0_38] : memref<256x32xf32, #tpu.memory_space<vmem>>, vector<256x32xf32>
    tpu.vector_store %arg4[%c0_37, %c0_38], %84 {strides = array<i32>} : memref<256x32xf32, #tpu.memory_space<vmem>>, vector<256x32xf32>,
    return
  }
  func.func @transform_0(%arg0: i32) -> (i32, i32) {
    %c0_i32 = arith.constant 0 : i32
    %c0_i32_0 = arith.constant 0 : i32
    return %arg0, %c0_i32 : i32, i32
  }
  func.func @transform_1(%arg0: i32) -> (i32, i32) {
    %c0_i32 = arith.constant 0 : i32
    %c0_i32_0 = arith.constant 0 : i32
    %c0_i32_1 = arith.constant 0 : i32
    return %c0_i32, %c0_i32_0 : i32, i32
  }
  func.func @transform_2(%arg0: i32) -> (i32, i32) {
    %c0_i32 = arith.constant 0 : i32
    %c0_i32_0 = arith.constant 0 : i32
    %c0_i32_1 = arith.constant 0 : i32
    return %c0_i32, %c0_i32_0 : i32, i32
  }
  func.func @transform_3(%arg0: i32) -> (i32, i32) {
    %c0_i32 = arith.constant 0 : i32
    %c0_i32_0 = arith.constant 0 : i32
    return %arg0, %c0_i32 : i32, i32
  }
}

</mosaic_0001>

<bundles_post_ra>
// kernel: tpu_custom_call.1
= control target key start
LH: loop header
LB: loop body
LE: loop exit
PB: predicated region body
PF: predicated region fallthrough
CT: control target
= control target key end

     0   :  { %s4106_s12 = smov 0   ;;  %s5068_s0 = inlined_call_operand.vmem [shape: f32[512,16], index: 0, kind: input, shape index: {}]   ;;  %s5069_s1 = inlined_call_operand.vmem [shape: f32[16,128], index: 1, kind: input, shape index: {}]   ;;  %s5070_s2 = inlined_call_operand.vmem [shape: f32[128,128], index: 2, kind: input, shape index: {}]   ;;  %s5071_s3 = inlined_call_operand.vmem [shape: f32[512,32], index: 3, kind: output, shape index: {}]  }
   0x1 LB: > { %s2821_s13 = sadd.s32 4294967295, %s4084_s12   ;;  %p2825_p0 = scmp.ge.s32.totalorder %s4084_s12, 1  ;;  %s4084_s12 = sphi %s4106_s12, %s13_s12  }
   0x2   : > { %p138_p1 = scmp.lt.s32.totalorder %s4084_s12, 3 }
   0x4   : > { %p139_p2 = pnand %p2825_p0, %p138_p1 }
   0x6   : > { %142 = sbr.rel (%p139_p2) target bundleno = 1289 (0x509), region = 32 }
   0xb   : > { %v207_v0 = vld [vmem:[%s5069_s1 + $0x8] sm:$0xff]  ;;  %v206_v1 = vld [vmem:[%s5069_s1] sm:$0xff]  ;;  %s2826_s18 = sshll.u32 %s2821_s13, 5  ;;  %v4123_v2 = vld [vmem:[%s5070_s2 + $0x78] sm:$0xff]  ;;  %vm208_vm0 = vcmask 130048   ;;  %vm2732_vm1 = vcmask 261120  }
   0xc   : > { %3410 = vmatprep.subr.mxu0 %v207_v0  ;;  %p163_p3 = scmp.lt.s32.totalorder %s2826_s18, 63  ;;  %3462 = vmatprep.subr.mxu1 %v4123_v2  ;;  %v4129_v3 = vld [vmem:[%s5070_s2 + $0x70] sm:$0xff]  ;;  %v4135_v4 = vld [vmem:[%s5070_s2 + $0x68] sm:$0xff]  ;;  %v4144_v5 = vld [vmem:[%s5070_s2 + $0x60] sm:$0xff] }
   0xd   : > { %3411 = vmatpush3.msra.mxu0 %v207_v0  ;;  %3463 = vmatpush3.msra.mxu1 %v4123_v2  ;;  %v4160_v6 = vld [vmem:[%s5070_s2 + $0x58] sm:$0xff]  ;;  %v4171_v10 = vld [vmem:[%s5070_s2 + $0x50] sm:$0xff]  ;;  %v4181_v12 = vld [vmem:[%s5070_s2 + $0x48] sm:$0xff] }
   0xe   : > { %3412 = vmatprep.subr.mxu0 %v206_v1  ;;  %s5094_s18 = smov (!%p163_p3, %s2826_s18), 63  ;;  %3464 = vmatprep.subr.mxu1 %v4129_v3  ;;  %v4190_v14 = vld [vmem:[%s5070_s2 + $0x40] sm:$0xff]  ;;  %v4201_v16 = vld [vmem:[%s5070_s2 + $0x38] sm:$0xff]  ;;  %v4210_v18 = vld [vmem:[%s5070_s2 + $0x30] sm:$0xff] }
   0xf   : > { %3413 = vmatpush3.msra.mxu0 %v206_v1  ;;  %3465 = vmatpush3.msra.mxu1 %v4129_v3  ;;  %s2827_s27 = sshll.u32 %s5094_s18, 3  ;;  %v4221_v20 = vld [vmem:[%s5070_s2 + $0x28] sm:$0xff]  ;;  %v4230_v22 = vld [vmem:[%s5070_s2 + $0x20] sm:$0xff]  ;;  %v4241_v24 = vld [vmem:[%s5070_s2 + $0x18] sm:$0xff] }
  0x10   : > { %3466 = vmatprep.subr.mxu1 %v4135_v4  ;;  %3574 = vmatprep.subr.mxu0 %v4123_v2  ;;  %s4154_s30 = scalar_lea.vmem %s5068_s0, %s2827_s27  ;;  %v4314_v47 = vld [vmem:[%s5070_s2 + $0x10] sm:$0xff]  ;;  %v4322_v48 = vld [vmem:[%s5070_s2 + $0x8] sm:$0xff]  ;;  %v4331_v49 = vld [vmem:[%s5070_s2] sm:$0xff]  ;;  %s4969_s15 = scalar_lea.vmem %s5071_s3, %s2827_s27 }
  0x11   : > { %3467 = vmatpush3.msra.mxu1 %v4135_v4  ;;  %v174_v7 = vld [vmem:[%s4154_s30] sm:$0xff]  ;;  %v175_v8 = vld [vmem:[%s4154_s30 + $0x8] sm:$0xff]  ;;  %v176_v9 = vld [vmem:[%s4154_s30 + $0x10] sm:$0xff] }
  0x12   : > { %3468 = vmatprep.subr.mxu1 %v4144_v5  ;;  %3414 = vmatprep.mubr.msk.f32.mxu0 %vm208_vm0, %v174_v7  ;;  %v177_v11 = vld [vmem:[%s4154_s30 + $0x18] sm:$0xff]  ;;  %v178_v13 = vld [vmem:[%s4154_s30 + $0x20] sm:$0xff]  ;;  %v179_v15 = vld [vmem:[%s4154_s30 + $0x28] sm:$0xff] }
  0x13   : > { %3469 = vmatpush3.msra.mxu1 %v4144_v5  ;;  %3415 = vmatmul.mubr.msk.f32.vlgmr.msra.gmra.mxu0 %vm208_vm0, %v175_v8  ;;  %v180_v17 = vld [vmem:[%s4154_s30 + $0x30] sm:$0xff]  ;;  %v181_v19 = vld [vmem:[%s4154_s30 + $0x38] sm:$0xff]  ;;  %v182_v21 = vld [vmem:[%s4154_s30 + $0x40] sm:$0xff] }
  0x14   : > { %3470 = vmatprep.subr.mxu1 %v4160_v6  ;;  %3417 = vmatprep.mubr.msk.f32.mxu0 %vm208_vm0, %v176_v9  ;;  %v183_v23 = vld [vmem:[%s4154_s30 + $0x48] sm:$0xff]  ;;  %v184_v25 = vld [vmem:[%s4154_s30 + $0x50] sm:$0xff]  ;;  %v185_v26 = vld [vmem:[%s4154_s30 + $0x58] sm:$0xff] }
  0x15   : > { %3471 = vmatpush3.msra.mxu1 %v4160_v6  ;;  %3575 = vmatpush3.msra.mxu0 %v4123_v2  ;;  %v186_v27 = vld [vmem:[%s4154_s30 + $0x60] sm:$0xff]  ;;  %v187_v28 = vld [vmem:[%s4154_s30 + $0x68] sm:$0xff]  ;;  %v188_v29 = vld [vmem:[%s4154_s30 + $0x70] sm:$0xff] }
  0x16   : > { %3472 = vmatprep.subr.mxu1 %v4171_v10  ;;  %3576 = vmatprep.subr.mxu0 %v4129_v3  ;;  %v189_v30 = vld [vmem:[%s4154_s30 + $0x78] sm:$0xff]  ;;  %v190_v31 = vld [vmem:[%s4154_s30 + $0x80] sm:$0xff]  ;;  %v191_v32 = vld [vmem:[%s4154_s30 + $0x88] sm:$0xff] }
  0x17   : > { %3473 = vmatpush3.msra.mxu1 %v4171_v10  ;;  %3418 = vmatmul.mubr.msk.f32.gmra.mxu0 %vm208_vm0, %v177_v11  ;;  %v192_v33 = vld [vmem:[%s4154_s30 + $0x90] sm:$0xff]  ;;  %v193_v34 = vld [vmem:[%s4154_s30 + $0x98] sm:$0xff]  ;;  %v194_v35 = vld [vmem:[%s4154_s30 + $0xa0] sm:$0xff] }
  0x18   : > { %3474 = vmatprep.subr.mxu1 %v4181_v12  ;;  %3420 = vmatprep.mubr.msk.f32.mxu0 %vm208_vm0, %v178_v13  ;;  %v195_v36 = vld [vmem:[%s4154_s30 + $0xa8] sm:$0xff]  ;;  %v196_v37 = vld [vmem:[%s4154_s30 + $0xb0] sm:$0xff]  ;;  %v197_v38 = vld [vmem:[%s4154_s30 + $0xb8] sm:$0xff] }
  0x19   : > { %3475 = vmatpush3.msra.mxu1 %v4181_v12  ;;  %3577 = vmatpush3.msra.mxu0 %v4129_v3  ;;  %v198_v39 = vld [vmem:[%s4154_s30 + $0xc0] sm:$0xff]  ;;  %v199_v40 = vld [vmem:[%s4154_s30 + $0xc8] sm:$0xff]  ;;  %v200_v41 = vld [vmem:[%s4154_s30 + $0xd0] sm:$0xff] }
  0x1a   : > { %3476 = vmatprep.subr.mxu1 %v4190_v14  ;;  %3578 = vmatprep.subr.mxu0 %v4135_v4  ;;  %v201_v42 = vld [vmem:[%s4154_s30 + $0xd8] sm:$0xff]  ;;  %v202_v43 = vld [vmem:[%s4154_s30 + $0xe0] sm:$0xff]  ;;  %v203_v44 = vld [vmem:[%s4154_s30 + $0xe8] sm:$0xff] }
  0x1b   : > { %3477 = vmatpush3.msra.mxu1 %v4190_v14  ;;  %3421 = vmatmul.mubr.msk.f32.gmra.mxu0 %vm208_vm0, %v179_v15  ;;  %v204_v45 = vld [vmem:[%s4154_s30 + $0xf0] sm:$0xff]  ;;  %v205_v46 = vld [vmem:[%s4154_s30 + $0xf8] sm:$0xff] }
  0x1c   : > { %3478 = vmatprep.subr.mxu1 %v4201_v16  ;;  %3423 = vmatprep.mubr.msk.f32.mxu0 %vm208_vm0, %v180_v17 }
  0x1d   : > { %3479 = vmatpush3.msra.mxu1 %v4201_v16  ;;  %3579 = vmatpush3.msra.mxu0 %v4135_v4 }
  0x1e   : > { %3480 = vmatprep.subr.mxu1 %v4210_v18  ;;  %3580 = vmatprep.subr.mxu0 %v4144_v5 }
  0x1f   : > { %3481 = vmatpush3.msra.mxu1 %v4210_v18  ;;  %3424 = vmatmul.mubr.msk.f32.gmra.mxu0 %vm208_vm0, %v181_v19 }
  0x20   : > { %3482 = vmatprep.subr.mxu1 %v4221_v20  ;;  %3426 = vmatprep.mubr.msk.f32.mxu0 %vm208_vm0, %v182_v21 }
  0x21   : > { %3483 = vmatpush3.msra.mxu1 %v4221_v20  ;;  %3581 = vmatpush3.msra.mxu0 %v4144_v5 }
  0x22   : > { %3484 = vmatprep.subr.mxu1 %v4230_v22  ;;  %3582 = vmatprep.subr.mxu0 %v4160_v6 }
  0x23   : > { %3485 = vmatpush3.msra.mxu1 %v4230_v22  ;;  %3427 = vmatmul.mubr.msk.f32.gmra.mxu0 %vm208_vm0, %v183_v23 }
  0x24   : > { %3486 = vmatprep.subr.mxu1 %v4241_v24  ;;  %3429 = vmatprep.mubr.msk.f32.mxu0 %vm208_vm0, %v184_v25 }
  0x25   : > { %3487 = vmatpush3.msra.mxu1 %v4241_v24  ;;  %3583 = vmatpush3.msra.mxu0 %v4160_v6 }
  0x26   : > { %3584 = vmatprep.subr.mxu0 %v4171_v10  ;;  %3488 = vmatprep.subr.mxu1 %v4314_v47 }
  0x27   : > { %3430 = vmatmul.mubr.msk.f32.gmra.mxu0 %vm208_vm0, %v185_v26  ;;  %3489 = vmatpush3.msra.mxu1 %v4314_v47 }
  0x28   : > { %3432 = vmatprep.mubr.msk.f32.mxu0 %vm208_vm0, %v186_v27  ;;  %3585 = vmatpush3.msra.mxu0 %v4171_v10 }
  0x29   : > { %3586 = vmatprep.subr.mxu0 %v4181_v12  ;;  %3490 = vmatprep.subr.mxu1 %v4322_v48 }
  0x2a   : > { %3587 = vmatpush3.msra.mxu0 %v4181_v12  ;;  %3491 = vmatpush3.msra.mxu1 %v4322_v48 }
  0x2b   : > { %3433 = vmatmul.mubr.msk.f32.gmra.mxu0 %vm208_vm0, %v187_v28  ;;  %3588 = vmatprep.subr.mxu0 %v4190_v14 }
  0x2c   : > { %3435 = vmatprep.mubr.msk.f32.mxu0 %vm208_vm0, %v188_v29  ;;  %3589 = vmatpush3.msra.mxu0 %v4190_v14 }
  0x2d   : > { %3590 = vmatprep.subr.mxu0 %v4201_v16  ;;  %3492 = vmatprep.subr.mxu1 %v4331_v49 }
  0x2e   : > { %3591 = vmatpush3.msra.mxu0 %v4201_v16  ;;  %3493 = vmatpush3.msra.mxu1 %v4331_v49 }
  0x2f   : > { %3436 = vmatmul.mubr.msk.f32.gmra.mxu0 %vm208_vm0, %v189_v30  ;;  %3592 = vmatprep.subr.mxu0 %v4210_v18 }
  0x30   : > { %3438 = vmatprep.mubr.msk.f32.mxu0 %vm208_vm0, %v190_v31  ;;  %3593 = vmatpush3.msra.mxu0 %v4210_v18 }
  0x31   : > { %3594 = vmatprep.subr.mxu0 %v4221_v20  ;;  %3518 = vmatprep.subr.mxu1 %v4123_v2 }
  0x32   : > { %3595 = vmatpush3.msra.mxu0 %v4221_v20 }
  0x33   : > { %3439 = vmatmul.mubr.msk.f32.gmra.mxu0 %vm208_vm0, %v191_v32  ;;  %3596 = vmatprep.subr.mxu0 %v4230_v22 }
  0x34   : > { %3441 = vmatprep.mubr.msk.f32.mxu0 %vm208_vm0, %v192_v33  ;;  %3597 = vmatpush3.msra.mxu0 %v4230_v22 }
  0x35   : > { %3598 = vmatprep.subr.mxu0 %v4241_v24 }
  0x36   : > { %3599 = vmatpush3.msra.mxu0 %v4241_v24 }
  0x37   : > { %3442 = vmatmul.mubr.msk.f32.gmra.mxu0 %vm208_vm0, %v193_v34  ;;  %3600 = vmatprep.subr.mxu0 %v4314_v47 }
  0x38   : > { %3444 = vmatprep.mubr.msk.f32.mxu0 %vm208_vm0, %v194_v35  ;;  %3601 = vmatpush3.msra.mxu0 %v4314_v47 }
  0x39   : > { %3602 = vmatprep.subr.mxu0 %v4322_v48 }
  0x3a   : > { %3603 = vmatpush3.msra.mxu0 %v4322_v48 }
  0x3b   : > { %3445 = vmatmul.mubr.msk.f32.gmra.mxu0 %vm208_vm0, %v195_v36  ;;  %3604 = vmatprep.subr.mxu0 %v4331_v49 }
  0x3c   : > { %3447 = vmatprep.mubr.msk.f32.mxu0 %vm208_vm0, %v196_v37  ;;  %3605 = vmatpush3.msra.mxu0 %v4331_v49 }
  0x3d   : > { %3686 = vmatprep.subr.mxu0 %v4123_v2 }
  0x3f   : > { %3448 = vmatmul.mubr.msk.f32.gmra.mxu0 %vm208_vm0, %v197_v38 }
  0x40   : > { %3450 = vmatprep.mubr.msk.f32.mxu0 %vm208_vm0, %v198_v39 }
  0x43   : > { %3451 = vmatmul.mubr.msk.f32.gmra.mxu0 %vm208_vm0, %v199_v40 }
  0x44   : > { %3453 = vmatprep.mubr.msk.f32.mxu0 %vm208_vm0, %v200_v41 }
  0x47   : > { %3454 = vmatmul.mubr.msk.f32.gmra.mxu0 %vm208_vm0, %v201_v42 }
  0x48   : > { %3456 = vmatprep.mubr.msk.f32.mxu0 %vm208_vm0, %v202_v43 }
  0x4b   : > { %3457 = vmatmul.mubr.msk.f32.gmra.mxu0 %vm208_vm0, %v203_v44 }
  0x4c   : > { %3459 = vmatprep.mubr.msk.f32.mxu0 %vm208_vm0, %v204_v45 }
  0x4f   : > { %3460 = vmatmul.mubr.msk.f32.gmra.mxu0 %vm208_vm0, %v205_v46 }
  0xd3   : > { %v4340_v50 = vpop.f32.mrf.mxu0 }
  0xd4   : > { %5081 = vst [vmem:[#allocation2_spill] sm:$0xff] %v4340_v50  ;;  %v2863_v52 = vclamps-f32 %v4340_v50, 0.01 }
  0xd5   : > { %v4342_v51 = vpop.f32.mrf.mxu0 }
  0xd6   : > { %5082 = vst [vmem:[#allocation3_spill] sm:$0xff] %v4342_v51  ;;  %v2862_v53 = vclamps-f32 %v4342_v51, 0.01  ;;  %v595_v57 = vsub.f32 %v4340_v50, %v2863_v52 }
  0xd7   : > { %v4346_v54 = vpop.f32.mrf.mxu0 }
  0xd8   : > { %5083 = vst [vmem:[#allocation4_spill] sm:$0xff] %v4346_v54  ;;  %v594_v55 = vsub.f32 %v4342_v51, %v2862_v53  ;;  %v2865_v58 = vclamps-f32 %v4346_v54, 0.01 }
  0xd9   : > { %v4349_v56 = vpop.f32.mrf.mxu0 }
  0xda   : > { %3494 = vmatprep.mubr.f32.mxu1 %v594_v55  ;;  %v2864_v59 = vclamps-f32 %v4349_v56, 0.01  ;;  %v597_v63 = vsub.f32 %v4346_v54, %v2865_v58 }
  0xdb   : > { %v4354_v60 = vpop.f32.mrf.mxu0  ;;  %3495 = vmatmul.mubr.f32.vlgmr.msra.gmra.mxu1 %v595_v57 }
  0xdc   : > { %3519 = vmatpush3.msra.mxu1 %v4123_v2  ;;  %v596_v61 = vsub.f32 %v4349_v56, %v2864_v59  ;;  %v2867_v0 = vclamps-f32 %v4354_v60, 0.01 }
  0xdd   : > { %3520 = vmatprep.subr.mxu1 %v4129_v3  ;;  %v4359_v62 = vpop.f32.mrf.mxu0 }
  0xde   : > { %3521 = vmatpush3.msra.mxu1 %v4129_v3  ;;  %3497 = vmatprep.mubr.f32.mxu1 %v596_v61  ;;  %v2866_v1 = vclamps-f32 %v4359_v62, 0.01  ;;  %v599_v11 = vsub.f32 %v4354_v60, %v2867_v0 }
  0xdf   : > { %3522 = vmatprep.subr.mxu1 %v4135_v4  ;;  %v4366_v7 = vpop.f32.mrf.mxu0  ;;  %3498 = vmatmul.mubr.f32.gmra.mxu1 %v597_v63 }
  0xe0   : > { %3523 = vmatpush3.msra.mxu1 %v4135_v4  ;;  %v598_v8 = vsub.f32 %v4359_v62, %v2866_v1  ;;  %v2869_v13 = vclamps-f32 %v4366_v7, 0.01 }
  0xe1   : > { %3524 = vmatprep.subr.mxu1 %v4144_v5  ;;  %v4371_v9 = vpop.f32.mrf.mxu0 }
  0xe2   : > { %3525 = vmatpush3.msra.mxu1 %v4144_v5  ;;  %3500 = vmatprep.mubr.f32.mxu1 %v598_v8  ;;  %v2868_v15 = vclamps-f32 %v4371_v9, 0.01  ;;  %v601_v23 = vsub.f32 %v4366_v7, %v2869_v13 }
  0xe3   : > { %3526 = vmatprep.subr.mxu1 %v4160_v6  ;;  %v4378_v17 = vpop.f32.mrf.mxu0  ;;  %3501 = vmatmul.mubr.f32.gmra.mxu1 %v599_v11 }
  0xe4   : > { %3527 = vmatpush3.msra.mxu1 %v4160_v6  ;;  %v600_v19 = vsub.f32 %v4371_v9, %v2868_v15  ;;  %v2871_v25 = vclamps-f32 %v4378_v17, 0.01 }
  0xe5   : > { %3528 = vmatprep.subr.mxu1 %v4171_v10  ;;  %v4383_v21 = vpop.f32.mrf.mxu0 }
  0xe6   : > { %3529 = vmatpush3.msra.mxu1 %v4171_v10  ;;  %3503 = vmatprep.mubr.f32.mxu1 %v600_v19  ;;  %v2870_v26 = vclamps-f32 %v4383_v21, 0.01  ;;  %v603_v30 = vsub.f32 %v4378_v17, %v2871_v25 }
  0xe7   : > { %3530 = vmatprep.subr.mxu1 %v4181_v12  ;;  %v4390_v27 = vpop.f32.mrf.mxu0  ;;  %3504 = vmatmul.mubr.f32.gmra.mxu1 %v601_v23 }
  0xe8   : > { %3531 = vmatpush3.msra.mxu1 %v4181_v12  ;;  %v602_v28 = vsub.f32 %v4383_v21, %v2870_v26  ;;  %v2873_v31 = vclamps-f32 %v4390_v27, 0.01 }
  0xe9   : > { %3532 = vmatprep.subr.mxu1 %v4190_v14  ;;  %v4395_v29 = vpop.f32.mrf.mxu0 }
  0xea   : > { %3533 = vmatpush3.msra.mxu1 %v4190_v14  ;;  %3506 = vmatprep.mubr.f32.mxu1 %v602_v28  ;;  %v2872_v32 = vclamps-f32 %v4395_v29, 0.01  ;;  %v605_v36 = vsub.f32 %v4390_v27, %v2873_v31 }
  0xeb   : > { %3534 = vmatprep.subr.mxu1 %v4201_v16  ;;  %v4402_v33 = vpop.f32.mrf.mxu0  ;;  %3507 = vmatmul.mubr.f32.gmra.mxu1 %v603_v30 }
  0xec   : > { %3535 = vmatpush3.msra.mxu1 %v4201_v16  ;;  %v604_v34 = vsub.f32 %v4395_v29, %v2872_v32  ;;  %v2875_v37 = vclamps-f32 %v4402_v33, 0.01 }
  0xed   : > { %3536 = vmatprep.subr.mxu1 %v4210_v18  ;;  %v4407_v35 = vpop.f32.mrf.mxu0 }
  0xee   : > { %3537 = vmatpush3.msra.mxu1 %v4210_v18  ;;  %3509 = vmatprep.mubr.f32.mxu1 %v604_v34  ;;  %v2874_v38 = vclamps-f32 %v4407_v35, 0.01  ;;  %v607_v42 = vsub.f32 %v4402_v33, %v2875_v37 }
  0xef   : > { %3538 = vmatprep.subr.mxu1 %v4221_v20  ;;  %v4414_v39 = vpop.f32.mrf.mxu0  ;;  %3510 = vmatmul.mubr.f32.gmra.mxu1 %v605_v36 }
  0xf0   : > { %3539 = vmatpush3.msra.mxu1 %v4221_v20  ;;  %v606_v40 = vsub.f32 %v4407_v35, %v2874_v38  ;;  %v2877_v43 = vclamps-f32 %v4414_v39, 0.01 }
  0xf1   : > { %3540 = vmatprep.subr.mxu1 %v4230_v22  ;;  %v4419_v41 = vpop.f32.mrf.mxu0 }
  0xf2   : > { %3541 = vmatpush3.msra.mxu1 %v4230_v22  ;;  %3512 = vmatprep.mubr.f32.mxu1 %v606_v40  ;;  %v2876_v44 = vclamps-f32 %v4419_v41, 0.01  ;;  %v609_v53 = vsub.f32 %v4414_v39, %v2877_v43 }
  0xf3   : > { %3542 = vmatprep.subr.mxu1 %v4241_v24  ;;  %v4426_v45 = vpop.f32.mrf.mxu0  ;;  %3513 = vmatmul.mubr.f32.gmra.mxu1 %v607_v42 }
  0xf4   : > { %3543 = vmatpush3.msra.mxu1 %v4241_v24  ;;  %v608_v46 = vsub.f32 %v4419_v41, %v2876_v44  ;;  %v2879_v55 = vclamps-f32 %v4426_v45, 0.01 }
  0xf5   : > { %3544 = vmatprep.subr.mxu1 %v4314_v47  ;;  %v4431_v52 = vpop.f32.mrf.mxu0 }
  0xf6   : > { %3545 = vmatpush3.msra.mxu1 %v4314_v47  ;;  %3515 = vmatprep.mubr.f32.mxu1 %v608_v46  ;;  %v2878_v57 = vclamps-f32 %v4431_v52, 0.01  ;;  %v611_v63 = vsub.f32 %v4426_v45, %v2879_v55 }
  0xf7   : > { %3546 = vmatprep.subr.mxu1 %v4322_v48  ;;  %v4438_v58 = vpop.f32.mrf.mxu0  ;;  %3516 = vmatmul.mubr.f32.gmra.mxu1 %v609_v53 }
  0xf8   : > { %3547 = vmatpush3.msra.mxu1 %v4322_v48  ;;  %v610_v59 = vsub.f32 %v4431_v52, %v2878_v57  ;;  %v2881_v0 = vclamps-f32 %v4438_v58, 0.01 }
  0xf9   : > { %3548 = vmatprep.subr.mxu1 %v4331_v49  ;;  %v4443_v61 = vpop.f32.mrf.mxu0 }
  0xfa   : > { %3549 = vmatpush3.msra.mxu1 %v4331_v49  ;;  %3550 = vmatprep.mubr.f32.mxu1 %v610_v59  ;;  %v2880_v1 = vclamps-f32 %v4443_v61, 0.01  ;;  %v613_v15 = vsub.f32 %v4438_v58, %v2881_v0 }
  0xfb   : > { %v4449_v8 = vpop.f32.mrf.mxu0  ;;  %3551 = vmatmul.mubr.f32.vlgmr.msra.gmra.mxu1 %v611_v63  ;;  %3630 = vmatprep.subr.mxu1 %v4123_v2 }
  0xfc   : > { %v612_v11 = vsub.f32 %v4443_v61, %v2880_v1  ;;  %3631 = vmatpush3.msra.mxu1 %v4123_v2  ;;  %v2883_v19 = vclamps-f32 %v4449_v8, 0.01 }
  0xfd   : > { %v4454_v13 = vpop.f32.mrf.mxu0  ;;  %3632 = vmatprep.subr.mxu1 %v4129_v3 }
  0xfe   : > { %3553 = vmatprep.mubr.f32.mxu1 %v612_v11  ;;  %v2882_v23 = vclamps-f32 %v4454_v13, 0.01  ;;  %3633 = vmatpush3.msra.mxu1 %v4129_v3  ;;  %v615_v30 = vsub.f32 %v4449_v8, %v2883_v19 }
  0xff   : > { %v4461_v25 = vpop.f32.mrf.mxu0  ;;  %3554 = vmatmul.mubr.f32.gmra.mxu1 %v613_v15  ;;  %3634 = vmatprep.subr.mxu1 %v4135_v4 }
 0x100   : > { %v614_v26 = vsub.f32 %v4454_v13, %v2882_v23  ;;  %3635 = vmatpush3.msra.mxu1 %v4135_v4  ;;  %v2885_v31 = vclamps-f32 %v4461_v25, 0.01 }
 0x101   : > { %v4466_v28 = vpop.f32.mrf.mxu0  ;;  %3636 = vmatprep.subr.mxu1 %v4144_v5 }
 0x102   : > { %3556 = vmatprep.mubr.f32.mxu1 %v614_v26  ;;  %v2884_v32 = vclamps-f32 %v4466_v28, 0.01  ;;  %3637 = vmatpush3.msra.mxu1 %v4144_v5  ;;  %v617_v38 = vsub.f32 %v4461_v25, %v2885_v31 }
 0x103   : > { %v4473_v34 = vpop.f32.mrf.mxu0  ;;  %3557 = vmatmul.mubr.f32.gmra.mxu1 %v615_v30  ;;  %3638 = vmatprep.subr.mxu1 %v4160_v6 }
 0x104   : > { %v616_v36 = vsub.f32 %v4466_v28, %v2884_v32  ;;  %3639 = vmatpush3.msra.mxu1 %v4160_v6  ;;  %v2887_v40 = vclamps-f32 %v4473_v34, 0.01 }
 0x105   : > { %v4478_v37 = vpop.f32.mrf.mxu0  ;;  %3640 = vmatprep.subr.mxu1 %v4171_v10 }
 0x106   : > { %3559 = vmatprep.mubr.f32.mxu1 %v616_v36  ;;  %v2886_v42 = vclamps-f32 %v4478_v37, 0.01  ;;  %3641 = vmatpush3.msra.mxu1 %v4171_v10  ;;  %v619_v53 = vsub.f32 %v4473_v34, %v2887_v40 }
 0x107   : > { %v4485_v43 = vpop.f32.mrf.mxu0  ;;  %3560 = vmatmul.mubr.f32.gmra.mxu1 %v617_v38  ;;  %3642 = vmatprep.subr.mxu1 %v4181_v12 }
 0x108   : > { %v618_v44 = vsub.f32 %v4478_v37, %v2886_v42  ;;  %3643 = vmatpush3.msra.mxu1 %v4181_v12  ;;  %v2889_v55 = vclamps-f32 %v4485_v43, 0.01 }
 0x109   : > { %v4490_v46 = vpop.f32.mrf.mxu0  ;;  %3644 = vmatprep.subr.mxu1 %v4190_v14 }
 0x10a   : > { %3562 = vmatprep.mubr.f32.mxu1 %v618_v44  ;;  %v2888_v57 = vclamps-f32 %v4490_v46, 0.01  ;;  %3645 = vmatpush3.msra.mxu1 %v4190_v14  ;;  %v621_v1 = vsub.f32 %v4485_v43, %v2889_v55 }
 0x10b   : > { %v4497_v59 = vpop.f32.mrf.mxu0  ;;  %3563 = vmatmul.mubr.f32.gmra.mxu1 %v619_v53  ;;  %3646 = vmatprep.subr.mxu1 %v4201_v16 }
 0x10c   : > { %v620_v63 = vsub.f32 %v4490_v46, %v2888_v57  ;;  %3647 = vmatpush3.msra.mxu1 %v4201_v16  ;;  %v2891_v11 = vclamps-f32 %v4497_v59, 0.01 }
 0x10d   : > { %v4502_v0 = vpop.f32.mrf.mxu0  ;;  %3648 = vmatprep.subr.mxu1 %v4210_v18 }
 0x10e   : > { %3565 = vmatprep.mubr.f32.mxu1 %v620_v63  ;;  %v2890_v15 = vclamps-f32 %v4502_v0, 0.01  ;;  %3649 = vmatpush3.msra.mxu1 %v4210_v18  ;;  %v623_v30 = vsub.f32 %v4497_v59, %v2891_v11 }
 0x10f   : > { %v4509_v19 = vpop.f32.mrf.mxu0  ;;  %3566 = vmatmul.mubr.f32.gmra.mxu1 %v621_v1  ;;  %3650 = vmatprep.subr.mxu1 %v4221_v20 }
 0x110   : > { %v622_v23 = vsub.f32 %v4502_v0, %v2890_v15  ;;  %3651 = vmatpush3.msra.mxu1 %v4221_v20  ;;  %v2893_v31 = vclamps-f32 %v4509_v19, 0.01 }
 0x111   : > { %v4514_v26 = vpop.f32.mrf.mxu0  ;;  %3652 = vmatprep.subr.mxu1 %v4230_v22 }
 0x112   : > { %3568 = vmatprep.mubr.f32.mxu1 %v622_v23  ;;  %v2892_v32 = vclamps-f32 %v4514_v26, 0.01  ;;  %3653 = vmatpush3.msra.mxu1 %v4230_v22  ;;  %v625_v38 = vsub.f32 %v4509_v19, %v2893_v31 }
 0x113   : > { %3569 = vmatmul.mubr.f32.gmra.mxu1 %v623_v30  ;;  %3654 = vmatprep.subr.mxu1 %v4241_v24 }
 0x114   : > { %v624_v36 = vsub.f32 %v4514_v26, %v2892_v32  ;;  %3655 = vmatpush3.msra.mxu1 %v4241_v24 }
 0x115   : > { %3656 = vmatprep.subr.mxu1 %v4314_v47 }
 0x116   : > { %3571 = vmatprep.mubr.f32.mxu1 %v624_v36  ;;  %3657 = vmatpush3.msra.mxu1 %v4314_v47 }
 0x117   : > { %3572 = vmatmul.mubr.f32.gmra.mxu1 %v625_v38  ;;  %3658 = vmatprep.subr.mxu1 %v4322_v48 }
 0x118   : > { %3659 = vmatpush3.msra.mxu1 %v4322_v48 }
 0x119   : > { %3660 = vmatprep.subr.mxu1 %v4331_v49 }
 0x11a   : > { %3661 = vmatpush3.msra.mxu1 %v4331_v49 }
 0x11b   : > { %3742 = vmatprep.subr.mxu1 %v4123_v2 }
 0x19b   : > { %v3496_v40 = vpop.f32.mrf.mxu1 }
 0x19c   : > { %v933_v42 = vadd.f32 %v3496_v40, %v4340_v50 }
 0x19d   : > { %v708_v44 = vpop.f32.mrf.mxu1 }
 0x19e   : > { %v932_v53 = vadd.f32 %v708_v44, %v4342_v51  ;;  %v2895_v55 = vclamps-f32 %v933_v42, 0.01 }
 0x19f   : > { %v3499_v57 = vpop.f32.mrf.mxu1 }
 0x1a0   : > { %v2894_v63 = vclamps-f32 %v932_v53, 0.01  ;;  %v935_v1 = vadd.f32 %v3499_v57, %v4346_v54  ;;  %v981_v30 = vsub.f32 %v933_v42, %v2895_v55 }
 0x1a1   : > { %v718_v11 = vpop.f32.mrf.mxu1 }
 0x1a2   : > { %v980_v15 = vsub.f32 %v932_v53, %v2894_v63  ;;  %v934_v23 = vadd.f32 %v718_v11, %v4349_v56  ;;  %v2897_v31 = vclamps-f32 %v935_v1, 0.01 }
 0x1a3   : > { %v3502_v32 = vpop.f32.mrf.mxu1 }
 0x1a4   : > { %v2896_v36 = vclamps-f32 %v934_v23, 0.01  ;;  %v937_v38 = vadd.f32 %v3502_v32, %v4354_v60  ;;  %3606 = vmatprep.mubr.f32.mxu0 %v980_v15  ;;  %v983_v51 = vsub.f32 %v935_v1, %v2897_v31 }
 0x1a5   : > { %v728_v40 = vpop.f32.mrf.mxu1  ;;  %3607 = vmatmul.mubr.f32.vlgmr.msra.gmra.mxu0 %v981_v30 }
 0x1a6   : > { %v982_v50 = vsub.f32 %v934_v23, %v2896_v36  ;;  %v936_v44 = vadd.f32 %v728_v40, %v4359_v62  ;;  %3687 = vmatpush3.msra.mxu0 %v4123_v2  ;;  %v2899_v57 = vclamps-f32 %v937_v38, 0.01 }
 0x1a7   : > { %v3505_v54 = vpop.f32.mrf.mxu1  ;;  %3688 = vmatprep.subr.mxu0 %v4129_v3 }
 0x1a8   : > { %v2898_v53 = vclamps-f32 %v936_v44, 0.01  ;;  %v939_v42 = vadd.f32 %v3505_v54, %v4366_v7  ;;  %3609 = vmatprep.mubr.f32.mxu0 %v982_v50  ;;  %3689 = vmatpush3.msra.mxu0 %v4129_v3  ;;  %v985_v1 = vsub.f32 %v937_v38, %v2899_v57 }
 0x1a9   : > { %v738_v55 = vpop.f32.mrf.mxu1  ;;  %3610 = vmatmul.mubr.f32.gmra.mxu0 %v983_v51  ;;  %3690 = vmatprep.subr.mxu0 %v4135_v4 }
 0x1aa   : > { %v984_v63 = vsub.f32 %v936_v44, %v2898_v53  ;;  %v938_v11 = vadd.f32 %v738_v55, %v4371_v9  ;;  %3691 = vmatpush3.msra.mxu0 %v4135_v4  ;;  %v2901_v15 = vclamps-f32 %v939_v42, 0.01 }
 0x1ab   : > { %v3508_v23 = vpop.f32.mrf.mxu1  ;;  %3692 = vmatprep.subr.mxu0 %v4144_v5 }
 0x1ac   : > { %v2900_v30 = vclamps-f32 %v938_v11, 0.01  ;;  %v941_v54 = vadd.f32 %v3508_v23, %v4378_v17  ;;  %3612 = vmatprep.mubr.f32.mxu0 %v984_v63  ;;  %3693 = vmatpush3.msra.mxu0 %v4144_v5  ;;  %v987_v32 = vsub.f32 %v939_v42, %v2901_v15 }
 0x1ad   : > { %v748_v50 = vpop.f32.mrf.mxu1  ;;  %3613 = vmatmul.mubr.f32.gmra.mxu0 %v985_v1  ;;  %3694 = vmatprep.subr.mxu0 %v4160_v6 }
 0x1ae   : > { %v986_v51 = vsub.f32 %v938_v11, %v2900_v30  ;;  %v940_v31 = vadd.f32 %v748_v50, %v4383_v21  ;;  %3695 = vmatpush3.msra.mxu0 %v4160_v6  ;;  %v2903_v36 = vclamps-f32 %v941_v54, 0.01 }
 0x1af   : > { %v3511_v38 = vpop.f32.mrf.mxu1  ;;  %3696 = vmatprep.subr.mxu0 %v4171_v10 }
 0x1b0   : > { %v2902_v40 = vclamps-f32 %v940_v31, 0.01  ;;  %v943_v44 = vadd.f32 %v3511_v38, %v4390_v27  ;;  %3615 = vmatprep.mubr.f32.mxu0 %v986_v51  ;;  %3697 = vmatpush3.msra.mxu0 %v4171_v10  ;;  %v989_v42 = vsub.f32 %v941_v54, %v2903_v36 }
 0x1b1   : > { %v758_v57 = vpop.f32.mrf.mxu1  ;;  %3616 = vmatmul.mubr.f32.gmra.mxu0 %v987_v32  ;;  %3698 = vmatprep.subr.mxu0 %v4181_v12 }
 0x1b2   : > { %v988_v53 = vsub.f32 %v940_v31, %v2902_v40  ;;  %v942_v55 = vadd.f32 %v758_v57, %v4395_v29  ;;  %3699 = vmatpush3.msra.mxu0 %v4181_v12  ;;  %v2905_v63 = vclamps-f32 %v943_v44, 0.01 }
 0x1b3   : > { %v3514_v11 = vpop.f32.mrf.mxu1  ;;  %3700 = vmatprep.subr.mxu0 %v4190_v14 }
 0x1b4   : > { %v2904_v1 = vclamps-f32 %v942_v55, 0.01  ;;  %v945_v15 = vadd.f32 %v3514_v11, %v4402_v33  ;;  %3618 = vmatprep.mubr.f32.mxu0 %v988_v53  ;;  %3701 = vmatpush3.msra.mxu0 %v4190_v14  ;;  %v991_v54 = vsub.f32 %v943_v44, %v2905_v63 }
 0x1b5   : > { %v768_v23 = vpop.f32.mrf.mxu1  ;;  %3619 = vmatmul.mubr.f32.gmra.mxu0 %v989_v42  ;;  %3702 = vmatprep.subr.mxu0 %v4201_v16 }
 0x1b6   : > { %v990_v30 = vsub.f32 %v942_v55, %v2904_v1  ;;  %v944_v50 = vadd.f32 %v768_v23, %v4407_v35  ;;  %3703 = vmatpush3.msra.mxu0 %v4201_v16  ;;  %v2907_v51 = vclamps-f32 %v945_v15, 0.01 }
 0x1b7   : > { %v3517_v31 = vpop.f32.mrf.mxu1  ;;  %3704 = vmatprep.subr.mxu0 %v4210_v18 }
 0x1b8   : > { %v2906_v32 = vclamps-f32 %v944_v50, 0.01  ;;  %v947_v36 = vadd.f32 %v3517_v31, %v4414_v39  ;;  %3621 = vmatprep.mubr.f32.mxu0 %v990_v30  ;;  %3705 = vmatpush3.msra.mxu0 %v4210_v18  ;;  %v993_v44 = vsub.f32 %v945_v15, %v2907_v51 }
 0x1b9   : > { %v778_v38 = vpop.f32.mrf.mxu1  ;;  %3622 = vmatmul.mubr.f32.gmra.mxu0 %v991_v54  ;;  %3706 = vmatprep.subr.mxu0 %v4221_v20 }
 0x1ba   : > { %v992_v40 = vsub.f32 %v944_v50, %v2906_v32  ;;  %v946_v57 = vadd.f32 %v778_v38, %v4419_v41  ;;  %3707 = vmatpush3.msra.mxu0 %v4221_v20  ;;  %v2909_v53 = vclamps-f32 %v947_v36, 0.01 }
 0x1bb   : > { %v3552_v55 = vpop.f32.mrf.mxu1  ;;  %3708 = vmatprep.subr.mxu0 %v4230_v22 }
 0x1bc   : > { %v2908_v42 = vclamps-f32 %v946_v57, 0.01  ;;  %v997_v63 = vadd.f32 %v3552_v55, %v4426_v45  ;;  %3624 = vmatprep.mubr.f32.mxu0 %v992_v40  ;;  %3709 = vmatpush3.msra.mxu0 %v4230_v22  ;;  %v995_v15 = vsub.f32 %v947_v36, %v2909_v53 }
 0x1bd   : > { %v853_v11 = vpop.f32.mrf.mxu1  ;;  %3625 = vmatmul.mubr.f32.gmra.mxu0 %v993_v44  ;;  %3710 = vmatprep.subr.mxu0 %v4241_v24 }
 0x1be   : > { %v994_v1 = vsub.f32 %v946_v57, %v2908_v42  ;;  %v996_v23 = vadd.f32 %v853_v11, %v4431_v52  ;;  %3711 = vmatpush3.msra.mxu0 %v4241_v24  ;;  %v2911_v30 = vclamps-f32 %v997_v63, 0.01 }
 0x1bf   : > { %v3555_v50 = vpop.f32.mrf.mxu1  ;;  %3712 = vmatprep.subr.mxu0 %v4314_v47 }
 0x1c0   : > { %v2910_v54 = vclamps-f32 %v996_v23, 0.01  ;;  %v999_v51 = vadd.f32 %v3555_v50, %v4438_v58  ;;  %3627 = vmatprep.mubr.f32.mxu0 %v994_v1  ;;  %3713 = vmatpush3.msra.mxu0 %v4314_v47  ;;  %v1045_v36 = vsub.f32 %v997_v63, %v2911_v30 }
 0x1c1   : > { %v863_v31 = vpop.f32.mrf.mxu1  ;;  %3628 = vmatmul.mubr.f32.gmra.mxu0 %v995_v15  ;;  %3714 = vmatprep.subr.mxu0 %v4322_v48 }
 0x1c2   : > { %v1044_v32 = vsub.f32 %v996_v23, %v2910_v54  ;;  %v998_v38 = vadd.f32 %v863_v31, %v4443_v61  ;;  %3715 = vmatpush3.msra.mxu0 %v4322_v48  ;;  %v2913_v40 = vclamps-f32 %v999_v51, 0.01 }
 0x1c3   : > { %v3558_v57 = vpop.f32.mrf.mxu1  ;;  %3716 = vmatprep.subr.mxu0 %v4331_v49 }
 0x1c4   : > { %v2912_v44 = vclamps-f32 %v998_v38, 0.01  ;;  %v1001_v53 = vadd.f32 %v3558_v57, %v4449_v8  ;;  %3662 = vmatprep.mubr.f32.mxu1 %v1044_v32  ;;  %3717 = vmatpush3.msra.mxu0 %v4331_v49  ;;  %v1047_v63 = vsub.f32 %v999_v51, %v2913_v40 }
 0x1c5   : > { %v873_v55 = vpop.f32.mrf.mxu1  ;;  %3663 = vmatmul.mubr.f32.vlgmr.msra.gmra.mxu1 %v1045_v36  ;;  %3798 = vmatprep.subr.mxu0 %v4123_v2 }
 0x1c6   : > { %v1046_v42 = vsub.f32 %v998_v38, %v2912_v44  ;;  %v1000_v11 = vadd.f32 %v873_v55, %v4454_v13  ;;  %3743 = vmatpush3.msra.mxu1 %v4123_v2  ;;  %v2915_v1 = vclamps-f32 %v1001_v53, 0.01 }
 0x1c7   : > { %v3561_v23 = vpop.f32.mrf.mxu1  ;;  %3744 = vmatprep.subr.mxu1 %v4129_v3 }
 0x1c8   : > { %v2914_v15 = vclamps-f32 %v1000_v11, 0.01  ;;  %v1003_v30 = vadd.f32 %v3561_v23, %v4461_v25  ;;  %3665 = vmatprep.mubr.f32.mxu1 %v1046_v42  ;;  %3745 = vmatpush3.msra.mxu1 %v4129_v3  ;;  %v1049_v2 = vsub.f32 %v1001_v53, %v2915_v1 }
 0x1c9   : > { %v883_v50 = vpop.f32.mrf.mxu1  ;;  %3666 = vmatmul.mubr.f32.gmra.mxu1 %v1047_v63  ;;  %3746 = vmatprep.subr.mxu1 %v4135_v4 }
 0x1ca   : > { %v1048_v54 = vsub.f32 %v1000_v11, %v2914_v15  ;;  %v1002_v31 = vadd.f32 %v883_v50, %v4466_v28  ;;  %3747 = vmatpush3.msra.mxu1 %v4135_v4  ;;  %v2917_v51 = vclamps-f32 %v1003_v30, 0.01 }
 0x1cb   : > { %v3564_v32 = vpop.f32.mrf.mxu1  ;;  %3748 = vmatprep.subr.mxu1 %v4144_v5 }
 0x1cc   : > { %v2916_v38 = vclamps-f32 %v1002_v31, 0.01  ;;  %v1005_v36 = vadd.f32 %v3564_v32, %v4473_v34  ;;  %3668 = vmatprep.mubr.f32.mxu1 %v1048_v54  ;;  %3749 = vmatpush3.msra.mxu1 %v4144_v5  ;;  %v1051_v4 = vsub.f32 %v1003_v30, %v2917_v51 }
 0x1cd   : > { %v893_v3 = vpop.f32.mrf.mxu1  ;;  %3669 = vmatmul.mubr.f32.gmra.mxu1 %v1049_v2  ;;  %3750 = vmatprep.subr.mxu1 %v4160_v6 }
 0x1ce   : > { %v1050_v40 = vsub.f32 %v1002_v31, %v2916_v38  ;;  %v1004_v57 = vadd.f32 %v893_v3, %v4478_v37  ;;  %3751 = vmatpush3.msra.mxu1 %v4160_v6  ;;  %v2919_v44 = vclamps-f32 %v1005_v36, 0.01 }
 0x1cf   : > { %v3567_v53 = vpop.f32.mrf.mxu1  ;;  %3752 = vmatprep.subr.mxu1 %v4171_v10 }
 0x1d0   : > { %v2918_v55 = vclamps-f32 %v1004_v57, 0.01  ;;  %v1007_v42 = vadd.f32 %v3567_v53, %v4485_v43  ;;  %3671 = vmatprep.mubr.f32.mxu1 %v1050_v40  ;;  %3753 = vmatpush3.msra.mxu1 %v4171_v10  ;;  %v1053_v6 = vsub.f32 %v1005_v36, %v2919_v44  ;;  %v5085_v44 = vld [vmem:[#allocation3_spill] sm:$0xff] }
 0x1d1   : > { %v903_v5 = vpop.f32.mrf.mxu1  ;;  %3672 = vmatmul.mubr.f32.gmra.mxu1 %v1051_v4  ;;  %3754 = vmatprep.subr.mxu1 %v4181_v12 }
 0x1d2   : > { %v1052_v11 = vsub.f32 %v1004_v57, %v2918_v55  ;;  %v1006_v63 = vadd.f32 %v903_v5, %v4490_v46  ;;  %3755 = vmatpush3.msra.mxu1 %v4181_v12  ;;  %v2921_v1 = vclamps-f32 %v1007_v42, 0.01  ;;  %v5086_v5 = vld [vmem:[#allocation4_spill] sm:$0xff] }
 0x1d3   : > { %v3570_v23 = vpop.f32.mrf.mxu1  ;;  %3756 = vmatprep.subr.mxu1 %v4190_v14 }
 0x1d4   : > { %v2920_v15 = vclamps-f32 %v1006_v63, 0.01  ;;  %v1009_v30 = vadd.f32 %v3570_v23, %v4497_v59  ;;  %3674 = vmatprep.mubr.f32.mxu1 %v1052_v11  ;;  %3757 = vmatpush3.msra.mxu1 %v4190_v14  ;;  %v1055_v12 = vsub.f32 %v1007_v42, %v2921_v1 }
 0x1d5   : > { %v913_v10 = vpop.f32.mrf.mxu1  ;;  %3675 = vmatmul.mubr.f32.gmra.mxu1 %v1053_v6  ;;  %3758 = vmatprep.subr.mxu1 %v4201_v16 }
 0x1d6   : > { %v1054_v50 = vsub.f32 %v1006_v63, %v2920_v15  ;;  %v1008_v54 = vadd.f32 %v913_v10, %v4502_v0  ;;  %3759 = vmatpush3.msra.mxu1 %v4201_v16  ;;  %v2923_v31 = vclamps-f32 %v1009_v30, 0.01 }
 0x1d7   : > { %v3573_v2 = vpop.f32.mrf.mxu1  ;;  %3760 = vmatprep.subr.mxu1 %v4210_v18 }
 0x1d8   : > { %v2922_v51 = vclamps-f32 %v1008_v54, 0.01  ;;  %v1011_v32 = vadd.f32 %v3573_v2, %v4509_v19  ;;  %3677 = vmatprep.mubr.f32.mxu1 %v1054_v50  ;;  %3761 = vmatpush3.msra.mxu1 %v4210_v18  ;;  %v1057_v16 = vsub.f32 %v1009_v30, %v2923_v31 }
 0x1d9   : > { %v923_v14 = vpop.f32.mrf.mxu1  ;;  %3678 = vmatmul.mubr.f32.gmra.mxu1 %v1055_v12  ;;  %3762 = vmatprep.subr.mxu1 %v4221_v20 }
 0x1da   : > { %v1056_v38 = vsub.f32 %v1008_v54, %v2922_v51  ;;  %v1010_v36 = vadd.f32 %v923_v14, %v4514_v26  ;;  %3763 = vmatpush3.msra.mxu1 %v4221_v20  ;;  %v2925_v3 = vclamps-f32 %v1011_v32, 0.01  ;;  %v4630_v20 = vld [vmem:[%s5070_s2 + $0x78] sm:$0xff] }
 0x1db   : > { %3764 = vmatprep.subr.mxu1 %v4230_v22 }
 0x1dc   : > { %v2924_v40 = vclamps-f32 %v1010_v36, 0.01  ;;  %3680 = vmatprep.mubr.f32.mxu1 %v1056_v38  ;;  %3765 = vmatpush3.msra.mxu1 %v4230_v22  ;;  %v1059_v57 = vsub.f32 %v1011_v32, %v2925_v3  ;;  %v4643_v32 = vld [vmem:[%s5070_s2 + $0x70] sm:$0xff] }
 0x1dd   : > { %3681 = vmatmul.mubr.f32.gmra.mxu1 %v1057_v16  ;;  %3766 = vmatprep.subr.mxu1 %v4241_v24  ;;  %v4651_v16 = vld [vmem:[%s5070_s2 + $0x68] sm:$0xff] }
 0x1de   : > { %v1058_v18 = vsub.f32 %v1010_v36, %v2924_v40  ;;  %3767 = vmatpush3.msra.mxu1 %v4241_v24  ;;  %v5084_v24 = vld [vmem:[#allocation2_spill] sm:$0xff] }
 0x1df   : > { %3768 = vmatprep.subr.mxu1 %v4314_v47 }
 0x1e0   : > { %3683 = vmatprep.mubr.f32.mxu1 %v1058_v18  ;;  %3769 = vmatpush3.msra.mxu1 %v4314_v47 }
 0x1e1   : > { %3684 = vmatmul.mubr.f32.gmra.mxu1 %v1059_v57  ;;  %3770 = vmatprep.subr.mxu1 %v4322_v48 }
 0x1e2   : > { %3771 = vmatpush3.msra.mxu1 %v4322_v48 }
 0x1e3   : > { %3772 = vmatprep.subr.mxu1 %v4331_v49 }
 0x1e4   : > { %3773 = vmatpush3.msra.mxu1 %v4331_v49 }
 0x1e5   : > { %3854 = vmatprep.subr.mxu1 %v4630_v20 }
 0x265   : > { %v3608_v22 = vpop.f32.mrf.mxu0 }
 0x266   : > { %v1351_v4 = vadd.f32 %v3608_v22, %v5084_v24 }
 0x267   : > { %v1126_v47 = vpop.f32.mrf.mxu0 }
 0x268   : > { %v1350_v53 = vadd.f32 %v1126_v47, %v5085_v44  ;;  %v2927_v55 = vclamps-f32 %v1351_v4, 0.01 }
 0x269   : > { %v3611_v42 = vpop.f32.mrf.mxu0 }
 0x26a   : > { %v2926_v48 = vclamps-f32 %v1350_v53, 0.01  ;;  %v1353_v11 = vadd.f32 %v3611_v42, %v5086_v5  ;;  %v1399_v1 = vsub.f32 %v1351_v4, %v2927_v55  ;;  %v4659_v4 = vld [vmem:[%s5070_s2 + $0x60] sm:$0xff]  ;;  %v4667_v42 = vld [vmem:[%s5070_s2 + $0x58] sm:$0xff] }
 0x26b   : > { %v1136_v63 = vpop.f32.mrf.mxu0 }
 0x26c   : > { %v1398_v49 = vsub.f32 %v1350_v53, %v2926_v48  ;;  %v1352_v6 = vadd.f32 %v1136_v63, %v4349_v56  ;;  %v2929_v23 = vclamps-f32 %v1353_v11, 0.01 }
 0x26d   : > { %v3614_v15 = vpop.f32.mrf.mxu0 }
 0x26e   : > { %v2928_v30 = vclamps-f32 %v1352_v6, 0.01  ;;  %v1355_v10 = vadd.f32 %v3614_v15, %v4354_v60  ;;  %3718 = vmatprep.mubr.f32.mxu0 %v1398_v49  ;;  %v1401_v31 = vsub.f32 %v1353_v11, %v2929_v23 }
 0x26f   : > { %v1146_v50 = vpop.f32.mrf.mxu0  ;;  %3719 = vmatmul.mubr.f32.vlgmr.msra.gmra.mxu0 %v1399_v1  ;;  %v4675_v1 = vld [vmem:[%s5070_s2 + $0x50] sm:$0xff] }
 0x270   : > { %v1400_v54 = vsub.f32 %v1352_v6, %v2928_v30  ;;  %v1354_v12 = vadd.f32 %v1146_v50, %v4359_v62  ;;  %3799 = vmatpush3.msra.mxu0 %v4630_v20  ;;  %v2931_v2 = vclamps-f32 %v1355_v10, 0.01 }
 0x271   : > { %v3617_v51 = vpop.f32.mrf.mxu0  ;;  %3800 = vmatprep.subr.mxu0 %v4643_v32 }
 0x272   : > { %v2930_v14 = vclamps-f32 %v1354_v12, 0.01  ;;  %v1357_v38 = vadd.f32 %v3617_v51, %v4366_v7  ;;  %3721 = vmatprep.mubr.f32.mxu0 %v1400_v54  ;;  %3801 = vmatpush3.msra.mxu0 %v4643_v32  ;;  %v1403_v18 = vsub.f32 %v1355_v10, %v2931_v2  ;;  %v4683_v10 = vld [vmem:[%s5070_s2 + $0x48] sm:$0xff]  ;;  %v4691_v51 = vld [vmem:[%s5070_s2 + $0x40] sm:$0xff] }
 0x273   : > { %v1156_v36 = vpop.f32.mrf.mxu0  ;;  %3722 = vmatmul.mubr.f32.gmra.mxu0 %v1401_v31  ;;  %3802 = vmatprep.subr.mxu0 %v4651_v16 }
 0x274   : > { %v1402_v3 = vsub.f32 %v1354_v12, %v2930_v14  ;;  %v1356_v40 = vadd.f32 %v1156_v36, %v4371_v9  ;;  %3803 = vmatpush3.msra.mxu0 %v4651_v16  ;;  %v2933_v57 = vclamps-f32 %v1357_v38, 0.01 }
 0x275   : > { %v3620_v22 = vpop.f32.mrf.mxu0  ;;  %3804 = vmatprep.subr.mxu0 %v4659_v4 }
 0x276   : > { %v2932_v47 = vclamps-f32 %v1356_v40, 0.01  ;;  %v1359_v53 = vadd.f32 %v3620_v22, %v4378_v17  ;;  %3724 = vmatprep.mubr.f32.mxu0 %v1402_v3  ;;  %3805 = vmatpush3.msra.mxu0 %v4659_v4  ;;  %v1405_v63 = vsub.f32 %v1357_v38, %v2933_v57  ;;  %v4699_v3 = vld [vmem:[%s5070_s2 + $0x38] sm:$0xff] }
 0x277   : > { %v1166_v55 = vpop.f32.mrf.mxu0  ;;  %3725 = vmatmul.mubr.f32.gmra.mxu0 %v1403_v18  ;;  %3806 = vmatprep.subr.mxu0 %v4667_v42 }
 0x278   : > { %v1404_v48 = vsub.f32 %v1356_v40, %v2932_v47  ;;  %v1358_v11 = vadd.f32 %v1166_v55, %v4383_v21  ;;  %3807 = vmatpush3.msra.mxu0 %v4667_v42  ;;  %v2935_v49 = vclamps-f32 %v1359_v53, 0.01 }
 0x279   : > { %v3623_v6 = vpop.f32.mrf.mxu0  ;;  %3808 = vmatprep.subr.mxu0 %v4675_v1 }
 0x27a   : > { %v2934_v23 = vclamps-f32 %v1358_v11, 0.01  ;;  %v1361_v15 = vadd.f32 %v3623_v6, %v4390_v27  ;;  %3727 = vmatprep.mubr.f32.mxu0 %v1404_v48  ;;  %3809 = vmatpush3.msra.mxu0 %v4675_v1  ;;  %v1407_v12 = vsub.f32 %v1359_v53, %v2935_v49  ;;  %v4707_v53 = vld [vmem:[%s5070_s2 + $0x30] sm:$0xff] }
 0x27b   : > { %v1176_v30 = vpop.f32.mrf.mxu0  ;;  %3728 = vmatmul.mubr.f32.gmra.mxu0 %v1405_v63  ;;  %3810 = vmatprep.subr.mxu0 %v4683_v10  ;;  %v4715_v63 = vld [vmem:[%s5070_s2 + $0x28] sm:$0xff] }
 0x27c   : > { %v1406_v50 = vsub.f32 %v1358_v11, %v2934_v23  ;;  %v1360_v54 = vadd.f32 %v1176_v30, %v4395_v29  ;;  %3811 = vmatpush3.msra.mxu0 %v4683_v10  ;;  %v2937_v31 = vclamps-f32 %v1361_v15, 0.01 }
 0x27d   : > { %v3626_v2 = vpop.f32.mrf.mxu0  ;;  %3812 = vmatprep.subr.mxu0 %v4691_v51 }
 0x27e   : > { %v2936_v14 = vclamps-f32 %v1360_v54, 0.01  ;;  %v1363_v38 = vadd.f32 %v3626_v2, %v4402_v33  ;;  %3730 = vmatprep.mubr.f32.mxu0 %v1406_v50  ;;  %3813 = vmatpush3.msra.mxu0 %v4691_v51  ;;  %v1409_v57 = vsub.f32 %v1361_v15, %v2937_v31  ;;  %v4723_v50 = vld [vmem:[%s5070_s2 + $0x20] sm:$0xff]  ;;  %v4731_v2 = vld [vmem:[%s5070_s2 + $0x18] sm:$0xff] }
 0x27f   : > { %v1186_v36 = vpop.f32.mrf.mxu0  ;;  %3731 = vmatmul.mubr.f32.gmra.mxu0 %v1407_v12  ;;  %3814 = vmatprep.subr.mxu0 %v4699_v3 }
 0x280   : > { %v1408_v40 = vsub.f32 %v1360_v54, %v2936_v14  ;;  %v1362_v18 = vadd.f32 %v1186_v36, %v4407_v35  ;;  %3815 = vmatpush3.msra.mxu0 %v4699_v3  ;;  %v2939_v22 = vclamps-f32 %v1363_v38, 0.01 }
 0x281   : > { %v3629_v47 = vpop.f32.mrf.mxu0  ;;  %3816 = vmatprep.subr.mxu0 %v4707_v53 }
 0x282   : > { %v2938_v55 = vclamps-f32 %v1362_v18, 0.01  ;;  %v1365_v48 = vadd.f32 %v3629_v47, %v4414_v39  ;;  %3733 = vmatprep.mubr.f32.mxu0 %v1408_v40  ;;  %3817 = vmatpush3.msra.mxu0 %v4707_v53  ;;  %v1411_v23 = vsub.f32 %v1363_v38, %v2939_v22 }
 0x283   : > { %v1196_v11 = vpop.f32.mrf.mxu0  ;;  %3734 = vmatmul.mubr.f32.gmra.mxu0 %v1409_v57  ;;  %3818 = vmatprep.subr.mxu0 %v4715_v63  ;;  %v4739_v57 = vld [vmem:[%s5070_s2 + $0x10] sm:$0xff] }
 0x284   : > { %v1410_v49 = vsub.f32 %v1362_v18, %v2938_v55  ;;  %v1364_v6 = vadd.f32 %v1196_v11, %v4419_v41  ;;  %3819 = vmatpush3.msra.mxu0 %v4715_v63  ;;  %v2941_v15 = vclamps-f32 %v1365_v48, 0.01 }
 0x285   : > { %v3664_v30 = vpop.f32.mrf.mxu1  ;;  %3820 = vmatprep.subr.mxu0 %v4723_v50 }
 0x286   : > { %v2940_v54 = vclamps-f32 %v1364_v6, 0.01  ;;  %v1415_v12 = vadd.f32 %v3664_v30, %v4426_v45  ;;  %3736 = vmatprep.mubr.f32.mxu0 %v1410_v49  ;;  %3821 = vmatpush3.msra.mxu0 %v4723_v50  ;;  %v1413_v36 = vsub.f32 %v1365_v48, %v2941_v15  ;;  %v4747_v48 = vld [vmem:[%s5070_s2 + $0x8] sm:$0xff]  ;;  %v4755_v30 = vld [vmem:[%s5070_s2] sm:$0xff] }
 0x287   : > { %v1271_v31 = vpop.f32.mrf.mxu1  ;;  %3737 = vmatmul.mubr.f32.gmra.mxu0 %v1411_v23  ;;  %3822 = vmatprep.subr.mxu0 %v4731_v2 }
 0x288   : > { %v1412_v14 = vsub.f32 %v1364_v6, %v2940_v54  ;;  %v1414_v38 = vadd.f32 %v1271_v31, %v4431_v52  ;;  %3823 = vmatpush3.msra.mxu0 %v4731_v2  ;;  %v2943_v40 = vclamps-f32 %v1415_v12, 0.01 }
 0x289   : > { %v3667_v18 = vpop.f32.mrf.mxu1  ;;  %3824 = vmatprep.subr.mxu0 %v4739_v57 }
 0x28a   : > { %v2942_v22 = vclamps-f32 %v1414_v38, 0.01  ;;  %v1417_v47 = vadd.f32 %v3667_v18, %v4438_v58  ;;  %3739 = vmatprep.mubr.f32.mxu0 %v1412_v14  ;;  %3825 = vmatpush3.msra.mxu0 %v4739_v57  ;;  %v1463_v6 = vsub.f32 %v1415_v12, %v2943_v40 }
 0x28b   : > { %v1281_v55 = vpop.f32.mrf.mxu1  ;;  %3740 = vmatmul.mubr.f32.gmra.mxu0 %v1413_v36  ;;  %3826 = vmatprep.subr.mxu0 %v4747_v48 }
 0x28c   : > { %v1462_v11 = vsub.f32 %v1414_v38, %v2942_v22  ;;  %v1416_v49 = vadd.f32 %v1281_v55, %v4443_v61  ;;  %3827 = vmatpush3.msra.mxu0 %v4747_v48  ;;  %v2945_v23 = vclamps-f32 %v1417_v47, 0.01 }
 0x28d   : > { %v3670_v15 = vpop.f32.mrf.mxu1  ;;  %3828 = vmatprep.subr.mxu0 %v4755_v30 }
 0x28e   : > { %v2944_v54 = vclamps-f32 %v1416_v49, 0.01  ;;  %v1419_v31 = vadd.f32 %v3670_v15, %v4449_v8  ;;  %3774 = vmatprep.mubr.f32.mxu1 %v1462_v11  ;;  %3829 = vmatpush3.msra.mxu0 %v4755_v30  ;;  %v1465_v36 = vsub.f32 %v1417_v47, %v2945_v23 }
 0x28f   : > { %v1291_v14 = vpop.f32.mrf.mxu1  ;;  %3775 = vmatmul.mubr.f32.vlgmr.msra.gmra.mxu1 %v1463_v6  ;;  %3910 = vmatprep.subr.mxu0 %v4630_v20 }
 0x290   : > { %v1464_v12 = vsub.f32 %v1416_v49, %v2944_v54  ;;  %v1418_v38 = vadd.f32 %v1291_v14, %v4454_v13  ;;  %3855 = vmatpush3.msra.mxu1 %v4630_v20  ;;  %v2947_v40 = vclamps-f32 %v1419_v31, 0.01 }
 0x291   : > { %v3673_v18 = vpop.f32.mrf.mxu1  ;;  %3856 = vmatprep.subr.mxu1 %v4643_v32 }
 0x292   : > { %v2946_v22 = vclamps-f32 %v1418_v38, 0.01  ;;  %v1421_v55 = vadd.f32 %v3673_v18, %v4461_v25  ;;  %3777 = vmatprep.mubr.f32.mxu1 %v1464_v12  ;;  %3857 = vmatpush3.msra.mxu1 %v4643_v32  ;;  %v1467_v47 = vsub.f32 %v1419_v31, %v2947_v40 }
 0x293   : > { %v1301_v11 = vpop.f32.mrf.mxu1  ;;  %3778 = vmatmul.mubr.f32.gmra.mxu1 %v1465_v36  ;;  %3858 = vmatprep.subr.mxu1 %v4651_v16 }
 0x294   : > { %v1466_v49 = vsub.f32 %v1418_v38, %v2946_v22  ;;  %v1420_v6 = vadd.f32 %v1301_v11, %v4466_v28  ;;  %3859 = vmatpush3.msra.mxu1 %v4651_v16  ;;  %v2949_v23 = vclamps-f32 %v1421_v55, 0.01 }
 0x295   : > { %v3676_v15 = vpop.f32.mrf.mxu1  ;;  %3860 = vmatprep.subr.mxu1 %v4659_v4 }
 0x296   : > { %v2948_v54 = vclamps-f32 %v1420_v6, 0.01  ;;  %v1423_v14 = vadd.f32 %v3676_v15, %v4473_v34  ;;  %3780 = vmatprep.mubr.f32.mxu1 %v1466_v49  ;;  %3861 = vmatpush3.msra.mxu1 %v4659_v4  ;;  %v1469_v31 = vsub.f32 %v1421_v55, %v2949_v23 }
 0x297   : > { %v1311_v12 = vpop.f32.mrf.mxu1  ;;  %3781 = vmatmul.mubr.f32.gmra.mxu1 %v1467_v47  ;;  %3862 = vmatprep.subr.mxu1 %v4667_v42 }
 0x298   : > { %v1468_v38 = vsub.f32 %v1420_v6, %v2948_v54  ;;  %v1422_v36 = vadd.f32 %v1311_v12, %v4478_v37  ;;  %3863 = vmatpush3.msra.mxu1 %v4667_v42  ;;  %v2951_v40 = vclamps-f32 %v1423_v14, 0.01 }
 0x299   : > { %v3679_v18 = vpop.f32.mrf.mxu1  ;;  %3864 = vmatprep.subr.mxu1 %v4675_v1 }
 0x29a   : > { %v2950_v22 = vclamps-f32 %v1422_v36, 0.01  ;;  %v1425_v11 = vadd.f32 %v3679_v18, %v4485_v43  ;;  %3783 = vmatprep.mubr.f32.mxu1 %v1468_v38  ;;  %3865 = vmatpush3.msra.mxu1 %v4675_v1  ;;  %v1471_v55 = vsub.f32 %v1423_v14, %v2951_v40 }
 0x29b   : > { %v1321_v49 = vpop.f32.mrf.mxu1  ;;  %3784 = vmatmul.mubr.f32.gmra.mxu1 %v1469_v31  ;;  %3866 = vmatprep.subr.mxu1 %v4683_v10 }
 0x29c   : > { %v1470_v6 = vsub.f32 %v1422_v36, %v2950_v22  ;;  %v1424_v47 = vadd.f32 %v1321_v49, %v4490_v46  ;;  %3867 = vmatpush3.msra.mxu1 %v4683_v10  ;;  %v2953_v23 = vclamps-f32 %v1425_v11, 0.01 }
 0x29d   : > { %v3682_v15 = vpop.f32.mrf.mxu1  ;;  %3868 = vmatprep.subr.mxu1 %v4691_v51 }
 0x29e   : > { %v2952_v54 = vclamps-f32 %v1424_v47, 0.01  ;;  %v1427_v12 = vadd.f32 %v3682_v15, %v4497_v59  ;;  %3786 = vmatprep.mubr.f32.mxu1 %v1470_v6  ;;  %3869 = vmatpush3.msra.mxu1 %v4691_v51  ;;  %v1473_v14 = vsub.f32 %v1425_v11, %v2953_v23 }
 0x29f   : > { %v1331_v38 = vpop.f32.mrf.mxu1  ;;  %3787 = vmatmul.mubr.f32.gmra.mxu1 %v1471_v55  ;;  %3870 = vmatprep.subr.mxu1 %v4699_v3 }
 0x2a0   : > { %v1472_v36 = vsub.f32 %v1424_v47, %v2952_v54  ;;  %v1426_v31 = vadd.f32 %v1331_v38, %v4502_v0  ;;  %3871 = vmatpush3.msra.mxu1 %v4699_v3  ;;  %v2955_v40 = vclamps-f32 %v1427_v12, 0.01 }
 0x2a1   : > { %v3685_v18 = vpop.f32.mrf.mxu1  ;;  %3872 = vmatprep.subr.mxu1 %v4707_v53 }
 0x2a2   : > { %v2954_v22 = vclamps-f32 %v1426_v31, 0.01  ;;  %v1429_v49 = vadd.f32 %v3685_v18, %v4509_v19  ;;  %3789 = vmatprep.mubr.f32.mxu1 %v1472_v36  ;;  %3873 = vmatpush3.msra.mxu1 %v4707_v53  ;;  %v1475_v11 = vsub.f32 %v1427_v12, %v2955_v40 }
 0x2a3   : > { %v1341_v6 = vpop.f32.mrf.mxu1  ;;  %3790 = vmatmul.mubr.f32.gmra.mxu1 %v1473_v14  ;;  %3874 = vmatprep.subr.mxu1 %v4715_v63 }
 0x2a4   : > { %v1474_v47 = vsub.f32 %v1426_v31, %v2954_v22  ;;  %v1428_v55 = vadd.f32 %v1341_v6, %v4514_v26  ;;  %3875 = vmatpush3.msra.mxu1 %v4715_v63  ;;  %v2957_v23 = vclamps-f32 %v1429_v49, 0.01 }
 0x2a5   : > { %3876 = vmatprep.subr.mxu1 %v4723_v50 }
 0x2a6   : > { %v2956_v15 = vclamps-f32 %v1428_v55, 0.01  ;;  %3792 = vmatprep.mubr.f32.mxu1 %v1474_v47  ;;  %3877 = vmatpush3.msra.mxu1 %v4723_v50  ;;  %v1477_v38 = vsub.f32 %v1429_v49, %v2957_v23 }
 0x2a7   : > { %3793 = vmatmul.mubr.f32.gmra.mxu1 %v1475_v11  ;;  %3878 = vmatprep.subr.mxu1 %v4731_v2 }
 0x2a8   : > { %v1476_v54 = vsub.f32 %v1428_v55, %v2956_v15  ;;  %3879 = vmatpush3.msra.mxu1 %v4731_v2 }
 0x2a9   : > { %3880 = vmatprep.subr.mxu1 %v4739_v57 }
 0x2aa   : > { %3795 = vmatprep.mubr.f32.mxu1 %v1476_v54  ;;  %3881 = vmatpush3.msra.mxu1 %v4739_v57 }
 0x2ab   : > { %3796 = vmatmul.mubr.f32.gmra.mxu1 %v1477_v38  ;;  %3882 = vmatprep.subr.mxu1 %v4747_v48 }
 0x2ac   : > { %3883 = vmatpush3.msra.mxu1 %v4747_v48 }
 0x2ad   : > { %3884 = vmatprep.subr.mxu1 %v4755_v30 }
 0x2ae   : > { %3885 = vmatpush3.msra.mxu1 %v4755_v30 }
 0x2af   : > { %4022 = vmatprep.subr.mxu1 %v4630_v20 }
 0x32f   : > { %v3720_v12 = vpop.f32.mrf.mxu0 }
 0x330   : > { %v1769_v36 = vadd.f32 %v3720_v12, %v5084_v24 }
 0x331   : > { %v1544_v31 = vpop.f32.mrf.mxu0 }
 0x332   : > { %v1768_v14 = vadd.f32 %v1544_v31, %v5085_v44  ;;  %v2959_v40 = vclamps-f32 %v1769_v36, 0.01 }
 0x333   : > { %v3723_v18 = vpop.f32.mrf.mxu0 }
 0x334   : > { %v2958_v22 = vclamps-f32 %v1768_v14, 0.01  ;;  %v1771_v49 = vadd.f32 %v3723_v18, %v5086_v5  ;;  %v1817_v11 = vsub.f32 %v1769_v36, %v2959_v40 }
 0x335   : > { %v1554_v6 = vpop.f32.mrf.mxu0 }
 0x336   : > { %v1816_v47 = vsub.f32 %v1768_v14, %v2958_v22  ;;  %v1770_v55 = vadd.f32 %v1554_v6, %v4349_v56  ;;  %v2961_v23 = vclamps-f32 %v1771_v49, 0.01 }
 0x337   : > { %v3726_v15 = vpop.f32.mrf.mxu0 }
 0x338   : > { %v2960_v54 = vclamps-f32 %v1770_v55, 0.01  ;;  %v1773_v38 = vadd.f32 %v3726_v15, %v4354_v60  ;;  %3830 = vmatprep.mubr.f32.mxu0 %v1816_v47  ;;  %v1819_v44 = vsub.f32 %v1771_v49, %v2961_v23 }
 0x339   : > { %v1564_v12 = vpop.f32.mrf.mxu0  ;;  %3831 = vmatmul.mubr.f32.vlgmr.msra.gmra.mxu0 %v1817_v11 }
 0x33a   : > { %v1818_v24 = vsub.f32 %v1770_v55, %v2960_v54  ;;  %v1772_v31 = vadd.f32 %v1564_v12, %v4359_v62  ;;  %3911 = vmatpush3.msra.mxu0 %v4630_v20  ;;  %v2963_v18 = vclamps-f32 %v1773_v38, 0.01 }
 0x33b   : > { %v3729_v5 = vpop.f32.mrf.mxu0  ;;  %3912 = vmatprep.subr.mxu0 %v4643_v32 }
 0x33c   : > { %v2962_v14 = vclamps-f32 %v1772_v31, 0.01  ;;  %v1775_v36 = vadd.f32 %v3729_v5, %v4366_v7  ;;  %3833 = vmatprep.mubr.f32.mxu0 %v1818_v24  ;;  %3913 = vmatpush3.msra.mxu0 %v4643_v32  ;;  %v1821_v49 = vsub.f32 %v1773_v38, %v2963_v18 }
 0x33d   : > { %v1574_v40 = vpop.f32.mrf.mxu0  ;;  %3834 = vmatmul.mubr.f32.gmra.mxu0 %v1819_v44  ;;  %3914 = vmatprep.subr.mxu0 %v4651_v16 }
 0x33e   : > { %v1820_v22 = vsub.f32 %v1772_v31, %v2962_v14  ;;  %v1774_v6 = vadd.f32 %v1574_v40, %v4371_v9  ;;  %3915 = vmatpush3.msra.mxu0 %v4651_v16  ;;  %v2965_v47 = vclamps-f32 %v1775_v36, 0.01 }
 0x33f   : > { %v3732_v55 = vpop.f32.mrf.mxu0  ;;  %3916 = vmatprep.subr.mxu0 %v4659_v4 }
 0x340   : > { %v2964_v11 = vclamps-f32 %v1774_v6, 0.01  ;;  %v1777_v5 = vadd.f32 %v3732_v55, %v4378_v17  ;;  %3836 = vmatprep.mubr.f32.mxu0 %v1820_v22  ;;  %3917 = vmatpush3.msra.mxu0 %v4659_v4  ;;  %v1823_v15 = vsub.f32 %v1775_v36, %v2965_v47 }
 0x341   : > { %v1584_v24 = vpop.f32.mrf.mxu0  ;;  %3837 = vmatmul.mubr.f32.gmra.mxu0 %v1821_v49  ;;  %3918 = vmatprep.subr.mxu0 %v4667_v42 }
 0x342   : > { %v1822_v44 = vsub.f32 %v1774_v6, %v2964_v11  ;;  %v1776_v23 = vadd.f32 %v1584_v24, %v4383_v21  ;;  %3919 = vmatpush3.msra.mxu0 %v4667_v42  ;;  %v2967_v54 = vclamps-f32 %v1777_v5, 0.01 }
 0x343   : > { %v3735_v38 = vpop.f32.mrf.mxu0  ;;  %3920 = vmatprep.subr.mxu0 %v4675_v1 }
 0x344   : > { %v2966_v12 = vclamps-f32 %v1776_v23, 0.01  ;;  %v1779_v31 = vadd.f32 %v3735_v38, %v4390_v27  ;;  %3839 = vmatprep.mubr.f32.mxu0 %v1822_v44  ;;  %3921 = vmatpush3.msra.mxu0 %v4675_v1  ;;  %v1825_v36 = vsub.f32 %v1777_v5, %v2967_v54 }
 0x345   : > { %v1594_v18 = vpop.f32.mrf.mxu0  ;;  %3840 = vmatmul.mubr.f32.gmra.mxu0 %v1823_v15  ;;  %3922 = vmatprep.subr.mxu0 %v4683_v10 }
 0x346   : > { %v1824_v14 = vsub.f32 %v1776_v23, %v2966_v12  ;;  %v1778_v40 = vadd.f32 %v1594_v18, %v4395_v29  ;;  %3923 = vmatpush3.msra.mxu0 %v4683_v10  ;;  %v2969_v22 = vclamps-f32 %v1779_v31, 0.01 }
 0x347   : > { %v3738_v6 = vpop.f32.mrf.mxu0  ;;  %3924 = vmatprep.subr.mxu0 %v4691_v51 }
 0x348   : > { %v2968_v49 = vclamps-f32 %v1778_v40, 0.01  ;;  %v1781_v47 = vadd.f32 %v3738_v6, %v4402_v33  ;;  %3842 = vmatprep.mubr.f32.mxu0 %v1824_v14  ;;  %3925 = vmatpush3.msra.mxu0 %v4691_v51  ;;  %v1827_v5 = vsub.f32 %v1779_v31, %v2969_v22 }
 0x349   : > { %v1604_v55 = vpop.f32.mrf.mxu0  ;;  %3843 = vmatmul.mubr.f32.gmra.mxu0 %v1825_v36  ;;  %3926 = vmatprep.subr.mxu0 %v4699_v3 }
 0x34a   : > { %v1826_v11 = vsub.f32 %v1778_v40, %v2968_v49  ;;  %v1780_v24 = vadd.f32 %v1604_v55, %v4407_v35  ;;  %3927 = vmatpush3.msra.mxu0 %v4699_v3  ;;  %v2971_v44 = vclamps-f32 %v1781_v47, 0.01 }
 0x34b   : > { %v3741_v23 = vpop.f32.mrf.mxu0  ;;  %3928 = vmatprep.subr.mxu0 %v4707_v53 }
 0x34c   : > { %v2970_v15 = vclamps-f32 %v1780_v24, 0.01  ;;  %v1783_v54 = vadd.f32 %v3741_v23, %v4414_v39  ;;  %3845 = vmatprep.mubr.f32.mxu0 %v1826_v11  ;;  %3929 = vmatpush3.msra.mxu0 %v4707_v53  ;;  %v1829_v31 = vsub.f32 %v1781_v47, %v2971_v44 }
 0x34d   : > { %v1614_v38 = vpop.f32.mrf.mxu0  ;;  %3846 = vmatmul.mubr.f32.gmra.mxu0 %v1827_v5  ;;  %3930 = vmatprep.subr.mxu0 %v4715_v63 }
 0x34e   : > { %v1828_v12 = vsub.f32 %v1780_v24, %v2970_v15  ;;  %v1782_v18 = vadd.f32 %v1614_v38, %v4419_v41  ;;  %3931 = vmatpush3.msra.mxu0 %v4715_v63  ;;  %v2973_v14 = vclamps-f32 %v1783_v54, 0.01 }
 0x34f   : > { %v3776_v40 = vpop.f32.mrf.mxu1  ;;  %3932 = vmatprep.subr.mxu0 %v4723_v50 }
 0x350   : > { %v2972_v36 = vclamps-f32 %v1782_v18, 0.01  ;;  %v1833_v22 = vadd.f32 %v3776_v40, %v4426_v45  ;;  %3848 = vmatprep.mubr.f32.mxu0 %v1828_v12  ;;  %3933 = vmatpush3.msra.mxu0 %v4723_v50  ;;  %v1831_v47 = vsub.f32 %v1783_v54, %v2973_v14 }
 0x351   : > { %v1689_v6 = vpop.f32.mrf.mxu1  ;;  %3849 = vmatmul.mubr.f32.gmra.mxu0 %v1829_v31  ;;  %3934 = vmatprep.subr.mxu0 %v4731_v2 }
 0x352   : > { %v1830_v49 = vsub.f32 %v1782_v18, %v2972_v36  ;;  %v1832_v55 = vadd.f32 %v1689_v6, %v4431_v52  ;;  %3935 = vmatpush3.msra.mxu0 %v4731_v2  ;;  %v2975_v11 = vclamps-f32 %v1833_v22, 0.01 }
 0x353   : > { %v3779_v24 = vpop.f32.mrf.mxu1  ;;  %3936 = vmatprep.subr.mxu0 %v4739_v57 }
 0x354   : > { %v2974_v5 = vclamps-f32 %v1832_v55, 0.01  ;;  %v1835_v44 = vadd.f32 %v3779_v24, %v4438_v58  ;;  %3851 = vmatprep.mubr.f32.mxu0 %v1830_v49  ;;  %3937 = vmatpush3.msra.mxu0 %v4739_v57  ;;  %v1881_v54 = vsub.f32 %v1833_v22, %v2975_v11 }
 0x355   : > { %v1699_v23 = vpop.f32.mrf.mxu1  ;;  %3852 = vmatmul.mubr.f32.gmra.mxu0 %v1831_v47  ;;  %3938 = vmatprep.subr.mxu0 %v4747_v48 }
 0x356   : > { %v1880_v15 = vsub.f32 %v1832_v55, %v2974_v5  ;;  %v1834_v38 = vadd.f32 %v1699_v23, %v4443_v61  ;;  %3939 = vmatpush3.msra.mxu0 %v4747_v48  ;;  %v2977_v12 = vclamps-f32 %v1835_v44, 0.01 }
 0x357   : > { %v3782_v18 = vpop.f32.mrf.mxu1  ;;  %3940 = vmatprep.subr.mxu0 %v4755_v30 }
 0x358   : > { %v2976_v31 = vclamps-f32 %v1834_v38, 0.01  ;;  %v1837_v14 = vadd.f32 %v3782_v18, %v4449_v8  ;;  %3886 = vmatprep.mubr.f32.mxu1 %v1880_v15  ;;  %3941 = vmatpush3.msra.mxu0 %v4755_v30  ;;  %v1883_v22 = vsub.f32 %v1835_v44, %v2977_v12 }
 0x359   : > { %v1709_v40 = vpop.f32.mrf.mxu1  ;;  %3887 = vmatmul.mubr.f32.vlgmr.msra.gmra.mxu1 %v1881_v54  ;;  %3966 = vmatprep.subr.mxu0 %v4630_v20 }
 0x35a   : > { %v1882_v36 = vsub.f32 %v1834_v38, %v2976_v31  ;;  %v1836_v6 = vadd.f32 %v1709_v40, %v4454_v13  ;;  %4038 = vmatpush3.msra.mxu1 %v4630_v20  ;;  %v2979_v49 = vclamps-f32 %v1837_v14, 0.01 }
 0x35b   : > { %v3785_v55 = vpop.f32.mrf.mxu1  ;;  %4023 = vmatprep.subr.mxu1 %v4643_v32 }
 0x35c   : > { %v2978_v47 = vclamps-f32 %v1836_v6, 0.01  ;;  %v1839_v11 = vadd.f32 %v3785_v55, %v4461_v25  ;;  %3889 = vmatprep.mubr.f32.mxu1 %v1882_v36  ;;  %4039 = vmatpush3.msra.mxu1 %v4643_v32  ;;  %v1885_v44 = vsub.f32 %v1837_v14, %v2979_v49 }
 0x35d   : > { %v1719_v24 = vpop.f32.mrf.mxu1  ;;  %3890 = vmatmul.mubr.f32.gmra.mxu1 %v1883_v22  ;;  %4024 = vmatprep.subr.mxu1 %v4651_v16 }
 0x35e   : > { %v1884_v5 = vsub.f32 %v1836_v6, %v2978_v47  ;;  %v1838_v23 = vadd.f32 %v1719_v24, %v4466_v28  ;;  %4040 = vmatpush3.msra.mxu1 %v4651_v16  ;;  %v2981_v15 = vclamps-f32 %v1839_v11, 0.01 }
 0x35f   : > { %v3788_v38 = vpop.f32.mrf.mxu1  ;;  %4025 = vmatprep.subr.mxu1 %v4659_v4 }
 0x360   : > { %v2980_v54 = vclamps-f32 %v1838_v23, 0.01  ;;  %v1841_v12 = vadd.f32 %v3788_v38, %v4473_v34  ;;  %3892 = vmatprep.mubr.f32.mxu1 %v1884_v5  ;;  %4041 = vmatpush3.msra.mxu1 %v4659_v4  ;;  %v1887_v14 = vsub.f32 %v1839_v11, %v2981_v15 }
 0x361   : > { %v1729_v18 = vpop.f32.mrf.mxu1  ;;  %3893 = vmatmul.mubr.f32.gmra.mxu1 %v1885_v44  ;;  %4026 = vmatprep.subr.mxu1 %v4667_v42 }
 0x362   : > { %v1886_v31 = vsub.f32 %v1838_v23, %v2980_v54  ;;  %v1840_v40 = vadd.f32 %v1729_v18, %v4478_v37  ;;  %4042 = vmatpush3.msra.mxu1 %v4667_v42  ;;  %v2983_v36 = vclamps-f32 %v1841_v12, 0.01 }
 0x363   : > { %v3791_v6 = vpop.f32.mrf.mxu1  ;;  %4027 = vmatprep.subr.mxu1 %v4675_v1 }
 0x364   : > { %v2982_v22 = vclamps-f32 %v1840_v40, 0.01  ;;  %v1843_v49 = vadd.f32 %v3791_v6, %v4485_v43  ;;  %3895 = vmatprep.mubr.f32.mxu1 %v1886_v31  ;;  %4043 = vmatpush3.msra.mxu1 %v4675_v1  ;;  %v1889_v11 = vsub.f32 %v1841_v12, %v2983_v36 }
 0x365   : > { %v1739_v55 = vpop.f32.mrf.mxu1  ;;  %3896 = vmatmul.mubr.f32.gmra.mxu1 %v1887_v14  ;;  %4028 = vmatprep.subr.mxu1 %v4683_v10 }
 0x366   : > { %v1888_v47 = vsub.f32 %v1840_v40, %v2982_v22  ;;  %v1842_v24 = vadd.f32 %v1739_v55, %v4490_v46  ;;  %4044 = vmatpush3.msra.mxu1 %v4683_v10  ;;  %v2985_v5 = vclamps-f32 %v1843_v49, 0.01 }
 0x367   : > { %v3794_v23 = vpop.f32.mrf.mxu1  ;;  %4029 = vmatprep.subr.mxu1 %v4691_v51 }
 0x368   : > { %v2984_v44 = vclamps-f32 %v1842_v24, 0.01  ;;  %v1845_v15 = vadd.f32 %v3794_v23, %v4497_v59  ;;  %3898 = vmatprep.mubr.f32.mxu1 %v1888_v47  ;;  %4045 = vmatpush3.msra.mxu1 %v4691_v51  ;;  %v1891_v12 = vsub.f32 %v1843_v49, %v2985_v5 }
 0x369   : > { %v1749_v38 = vpop.f32.mrf.mxu1  ;;  %3899 = vmatmul.mubr.f32.gmra.mxu1 %v1889_v11  ;;  %4030 = vmatprep.subr.mxu1 %v4699_v3 }
 0x36a   : > { %v1890_v54 = vsub.f32 %v1842_v24, %v2984_v44  ;;  %v1844_v18 = vadd.f32 %v1749_v38, %v4502_v0  ;;  %4046 = vmatpush3.msra.mxu1 %v4699_v3  ;;  %v2987_v31 = vclamps-f32 %v1845_v15, 0.01  ;;  %v5087_v44 = vld [vmem:[#allocation2_spill] sm:$0xff] }
 0x36b   : > { %v3797_v40 = vpop.f32.mrf.mxu1  ;;  %4031 = vmatprep.subr.mxu1 %v4707_v53 }
 0x36c   : > { %v2986_v14 = vclamps-f32 %v1844_v18, 0.01  ;;  %v1847_v36 = vadd.f32 %v3797_v40, %v4509_v19  ;;  %3901 = vmatprep.mubr.f32.mxu1 %v1890_v54  ;;  %4047 = vmatpush3.msra.mxu1 %v4707_v53  ;;  %v1893_v49 = vsub.f32 %v1845_v15, %v2987_v31  ;;  %v5088_v54 = vld [vmem:[#allocation3_spill] sm:$0xff] }
 0x36d   : > { %v1759_v6 = vpop.f32.mrf.mxu1  ;;  %3902 = vmatmul.mubr.f32.gmra.mxu1 %v1891_v12  ;;  %4032 = vmatprep.subr.mxu1 %v4715_v63 }
 0x36e   : > { %v1892_v22 = vsub.f32 %v1844_v18, %v2986_v14  ;;  %v1846_v55 = vadd.f32 %v1759_v6, %v4514_v26  ;;  %4048 = vmatpush3.msra.mxu1 %v4715_v63  ;;  %v2989_v47 = vclamps-f32 %v1847_v36, 0.01  ;;  %v5089_v14 = vld [vmem:[#allocation4_spill] sm:$0xff] }
 0x36f   : > { %4033 = vmatprep.subr.mxu1 %v4723_v50 }
 0x370   : > { %v2988_v24 = vclamps-f32 %v1846_v55, 0.01  ;;  %3904 = vmatprep.mubr.f32.mxu1 %v1892_v22  ;;  %4049 = vmatpush3.msra.mxu1 %v4723_v50  ;;  %v1895_v5 = vsub.f32 %v1847_v36, %v2989_v47 }
 0x371   : > { %3905 = vmatmul.mubr.f32.gmra.mxu1 %v1893_v49  ;;  %4034 = vmatprep.subr.mxu1 %v4731_v2 }
 0x372   : > { %v1894_v11 = vsub.f32 %v1846_v55, %v2988_v24  ;;  %4050 = vmatpush3.msra.mxu1 %v4731_v2 }
 0x373   : > { %4035 = vmatprep.subr.mxu1 %v4739_v57 }
 0x374   : > { %3907 = vmatprep.mubr.f32.mxu1 %v1894_v11  ;;  %4051 = vmatpush3.msra.mxu1 %v4739_v57 }
 0x375   : > { %3908 = vmatmul.mubr.f32.gmra.mxu1 %v1895_v5  ;;  %4036 = vmatprep.subr.mxu1 %v4747_v48 }
 0x376   : > { %4052 = vmatpush3.msra.mxu1 %v4747_v48 }
 0x377   : > { %4037 = vmatprep.subr.mxu1 %v4755_v30 }
 0x378   : > { %4053 = vmatpush3.msra.mxu1 %v4755_v30 }
 0x3f9   : > { %v3832_v23 = vpop.f32.mrf.mxu0 }
 0x3fa   : > { %v2187_v15 = vadd.f32 %v3832_v23, %v5087_v44 }
 0x3fb   : > { %v1962_v38 = vpop.f32.mrf.mxu0 }
 0x3fc   : > { %v2186_v18 = vadd.f32 %v1962_v38, %v5088_v54  ;;  %v2991_v12 = vclamps-f32 %v2187_v15, 0.01 }
 0x3fd   : > { %v3835_v31 = vpop.f32.mrf.mxu0 }
 0x3fe   : > { %v2990_v40 = vclamps-f32 %v2186_v18, 0.01  ;;  %v2189_v36 = vadd.f32 %v3835_v31, %v5089_v14  ;;  %v2235_v49 = vsub.f32 %v2187_v15, %v2991_v12 }
 0x3ff   : > { %v1972_v6 = vpop.f32.mrf.mxu0 }
 0x400   : > { %v2234_v22 = vsub.f32 %v2186_v18, %v2990_v40  ;;  %v2188_v55 = vadd.f32 %v1972_v6, %v4349_v56  ;;  %v2993_v47 = vclamps-f32 %v2189_v36, 0.01 }
 0x401   : > { %v3838_v24 = vpop.f32.mrf.mxu0 }
 0x402   : > { %v2992_v11 = vclamps-f32 %v2188_v55, 0.01  ;;  %v2191_v5 = vadd.f32 %v3838_v24, %v4354_v60  ;;  %3942 = vmatprep.mubr.f32.mxu0 %v2234_v22  ;;  %v2237_v54 = vsub.f32 %v2189_v36, %v2993_v47 }
 0x403   : > { %v1982_v23 = vpop.f32.mrf.mxu0  ;;  %3943 = vmatmul.mubr.f32.vlgmr.msra.gmra.mxu0 %v2235_v49 }
 0x404   : > { %v2236_v44 = vsub.f32 %v2188_v55, %v2992_v11  ;;  %v2190_v38 = vadd.f32 %v1982_v23, %v4359_v62  ;;  %3967 = vmatpush3.msra.mxu0 %v4630_v20  ;;  %v2995_v31 = vclamps-f32 %v2191_v5, 0.01 }
 0x405   : > { %v3841_v14 = vpop.f32.mrf.mxu0  ;;  %3968 = vmatprep.subr.mxu0 %v4643_v32 }
 0x406   : > { %v2994_v18 = vclamps-f32 %v2190_v38, 0.01  ;;  %v2193_v15 = vadd.f32 %v3841_v14, %v4366_v7  ;;  %3945 = vmatprep.mubr.f32.mxu0 %v2236_v44  ;;  %3969 = vmatpush3.msra.mxu0 %v4643_v32  ;;  %v2239_v20 = vsub.f32 %v2191_v5, %v2995_v31 }
 0x407   : > { %v1992_v12 = vpop.f32.mrf.mxu0  ;;  %3946 = vmatmul.mubr.f32.gmra.mxu0 %v2237_v54  ;;  %3970 = vmatprep.subr.mxu0 %v4651_v16 }
 0x408   : > { %v2238_v40 = vsub.f32 %v2190_v38, %v2994_v18  ;;  %v2192_v6 = vadd.f32 %v1992_v12, %v4371_v9  ;;  %3971 = vmatpush3.msra.mxu0 %v4651_v16  ;;  %v2997_v36 = vclamps-f32 %v2193_v15, 0.01 }
 0x409   : > { %v3844_v22 = vpop.f32.mrf.mxu0  ;;  %3972 = vmatprep.subr.mxu0 %v4659_v4 }
 0x40a   : > { %v2996_v55 = vclamps-f32 %v2192_v6, 0.01  ;;  %v2195_v14 = vadd.f32 %v3844_v22, %v4378_v17  ;;  %3948 = vmatprep.mubr.f32.mxu0 %v2238_v40  ;;  %3973 = vmatpush3.msra.mxu0 %v4659_v4  ;;  %v2241_v16 = vsub.f32 %v2193_v15, %v2997_v36 }
 0x40b   : > { %v2002_v32 = vpop.f32.mrf.mxu0  ;;  %3949 = vmatmul.mubr.f32.gmra.mxu0 %v2239_v20  ;;  %3974 = vmatprep.subr.mxu0 %v4667_v42 }
 0x40c   : > { %v2240_v44 = vsub.f32 %v2192_v6, %v2996_v55  ;;  %v2194_v54 = vadd.f32 %v2002_v32, %v4383_v21  ;;  %3975 = vmatpush3.msra.mxu0 %v4667_v42  ;;  %v2999_v49 = vclamps-f32 %v2195_v14, 0.01 }
 0x40d   : > { %v3847_v47 = vpop.f32.mrf.mxu0  ;;  %3976 = vmatprep.subr.mxu0 %v4675_v1 }
 0x40e   : > { %v2998_v24 = vclamps-f32 %v2194_v54, 0.01  ;;  %v2197_v11 = vadd.f32 %v3847_v47, %v4390_v27  ;;  %3951 = vmatprep.mubr.f32.mxu0 %v2240_v44  ;;  %3977 = vmatpush3.msra.mxu0 %v4675_v1  ;;  %v2243_v42 = vsub.f32 %v2195_v14, %v2999_v49 }
 0x40f   : > { %v2012_v4 = vpop.f32.mrf.mxu0  ;;  %3952 = vmatmul.mubr.f32.gmra.mxu0 %v2241_v16  ;;  %3978 = vmatprep.subr.mxu0 %v4683_v10 }
 0x410   : > { %v2242_v5 = vsub.f32 %v2194_v54, %v2998_v24  ;;  %v2196_v23 = vadd.f32 %v2012_v4, %v4395_v29  ;;  %3979 = vmatpush3.msra.mxu0 %v4683_v10  ;;  %v3001_v38 = vclamps-f32 %v2197_v11, 0.01 }
 0x411   : > { %v3850_v31 = vpop.f32.mrf.mxu0  ;;  %3980 = vmatprep.subr.mxu0 %v4691_v51 }
 0x412   : > { %v3000_v18 = vclamps-f32 %v2196_v23, 0.01  ;;  %v2199_v15 = vadd.f32 %v3850_v31, %v4402_v33  ;;  %3954 = vmatprep.mubr.f32.mxu0 %v2242_v5  ;;  %3981 = vmatpush3.msra.mxu0 %v4691_v51  ;;  %v2245_v10 = vsub.f32 %v2197_v11, %v3001_v38 }
 0x413   : > { %v2022_v1 = vpop.f32.mrf.mxu0  ;;  %3955 = vmatmul.mubr.f32.gmra.mxu0 %v2243_v42  ;;  %3982 = vmatprep.subr.mxu0 %v4699_v3 }
 0x414   : > { %v2244_v12 = vsub.f32 %v2196_v23, %v3000_v18  ;;  %v2198_v40 = vadd.f32 %v2022_v1, %v4407_v35  ;;  %3983 = vmatpush3.msra.mxu0 %v4699_v3  ;;  %v3003_v6 = vclamps-f32 %v2199_v15, 0.01 }
 0x415   : > { %v3853_v20 = vpop.f32.mrf.mxu0  ;;  %3984 = vmatprep.subr.mxu0 %v4707_v53 }
 0x416   : > { %v3002_v36 = vclamps-f32 %v2198_v40, 0.01  ;;  %v2201_v22 = vadd.f32 %v3853_v20, %v4414_v39  ;;  %3957 = vmatprep.mubr.f32.mxu0 %v2244_v12  ;;  %3985 = vmatpush3.msra.mxu0 %v4707_v53  ;;  %v2247_v3 = vsub.f32 %v2199_v15, %v3003_v6 }
 0x417   : > { %v2032_v51 = vpop.f32.mrf.mxu0  ;;  %3958 = vmatmul.mubr.f32.gmra.mxu0 %v2245_v10  ;;  %3986 = vmatprep.subr.mxu0 %v4715_v63 }
 0x418   : > { %v2246_v55 = vsub.f32 %v2198_v40, %v3002_v36  ;;  %v2200_v14 = vadd.f32 %v2032_v51, %v4419_v41  ;;  %3987 = vmatpush3.msra.mxu0 %v4715_v63  ;;  %v3005_v32 = vclamps-f32 %v2201_v22, 0.01 }
 0x419   : > { %v3888_v44 = vpop.f32.mrf.mxu1  ;;  %3988 = vmatprep.subr.mxu0 %v4723_v50 }
 0x41a   : > { %v3004_v54 = vclamps-f32 %v2200_v14, 0.01  ;;  %v2251_v16 = vadd.f32 %v3888_v44, %v4426_v45  ;;  %3960 = vmatprep.mubr.f32.mxu0 %v2246_v55  ;;  %3989 = vmatpush3.msra.mxu0 %v4723_v50  ;;  %v2249_v63 = vsub.f32 %v2201_v22, %v3005_v32 }
 0x41b   : > { %v2107_v53 = vpop.f32.mrf.mxu1  ;;  %3961 = vmatmul.mubr.f32.gmra.mxu0 %v2247_v3  ;;  %3990 = vmatprep.subr.mxu0 %v4731_v2 }
 0x41c   : > { %v2248_v49 = vsub.f32 %v2200_v14, %v3004_v54  ;;  %v2250_v47 = vadd.f32 %v2107_v53, %v4431_v52  ;;  %3991 = vmatpush3.msra.mxu0 %v4731_v2  ;;  %v3007_v24 = vclamps-f32 %v2251_v16, 0.01 }
 0x41d   : > { %v3891_v11 = vpop.f32.mrf.mxu1  ;;  %3992 = vmatprep.subr.mxu0 %v4739_v57 }
 0x41e   : > { %v3006_v4 = vclamps-f32 %v2250_v47, 0.01  ;;  %v2253_v5 = vadd.f32 %v3891_v11, %v4438_v58  ;;  %3963 = vmatprep.mubr.f32.mxu0 %v2248_v49  ;;  %3993 = vmatpush3.msra.mxu0 %v4739_v57  ;;  %v2299_v2 = vsub.f32 %v2251_v16, %v3007_v24 }
 0x41f   : > { %v2117_v50 = vpop.f32.mrf.mxu1  ;;  %3964 = vmatmul.mubr.f32.gmra.mxu0 %v2249_v63  ;;  %3994 = vmatprep.subr.mxu0 %v4747_v48 }
 0x420   : > { %v2298_v23 = vsub.f32 %v2250_v47, %v3006_v4  ;;  %v2252_v42 = vadd.f32 %v2117_v50, %v4443_v61  ;;  %3995 = vmatpush3.msra.mxu0 %v4747_v48  ;;  %v3009_v38 = vclamps-f32 %v2253_v5, 0.01 }
 0x421   : > { %v3894_v31 = vpop.f32.mrf.mxu1  ;;  %3996 = vmatprep.subr.mxu0 %v4755_v30 }
 0x422   : > { %v3008_v18 = vclamps-f32 %v2252_v42, 0.01  ;;  %v2255_v15 = vadd.f32 %v3894_v31, %v4449_v8  ;;  %3997 = vmatpush3.msra.mxu0 %v4755_v30  ;;  %3998 = vmatprep.mubr.f32.mxu0 %v2298_v23  ;;  %v2301_v40 = vsub.f32 %v2253_v5, %v3009_v38 }
 0x423   : > { %v2127_v57 = vpop.f32.mrf.mxu1  ;;  %3999 = vmatmul.mubr.f32.vlgmr.msra.gmra.mxu0 %v2299_v2 }
 0x424   : > { %v2300_v1 = vsub.f32 %v2252_v42, %v3008_v18  ;;  %v2254_v12 = vadd.f32 %v2127_v57, %v4454_v13  ;;  %v3011_v10 = vclamps-f32 %v2255_v15, 0.01 }
 0x425   : > { %v3897_v6 = vpop.f32.mrf.mxu1 }
 0x426   : > { %v3010_v48 = vclamps-f32 %v2254_v12, 0.01  ;;  %v2257_v20 = vadd.f32 %v3897_v6, %v4461_v25  ;;  %4001 = vmatprep.mubr.f32.mxu0 %v2300_v1  ;;  %v2303_v55 = vsub.f32 %v2255_v15, %v3011_v10 }
 0x427   : > { %v2137_v36 = vpop.f32.mrf.mxu1  ;;  %4002 = vmatmul.mubr.f32.gmra.mxu0 %v2301_v40 }
 0x428   : > { %v2302_v22 = vsub.f32 %v2254_v12, %v3010_v48  ;;  %v2256_v51 = vadd.f32 %v2137_v36, %v4466_v28  ;;  %v3013_v30 = vclamps-f32 %v2257_v20, 0.01 }
 0x429   : > { %v3900_v14 = vpop.f32.mrf.mxu1 }
 0x42a   : > { %v3012_v3 = vclamps-f32 %v2256_v51, 0.01  ;;  %v2259_v32 = vadd.f32 %v3900_v14, %v4473_v34  ;;  %4004 = vmatprep.mubr.f32.mxu0 %v2302_v22  ;;  %v2305_v53 = vsub.f32 %v2257_v20, %v3013_v30 }
 0x42b   : > { %v2147_v44 = vpop.f32.mrf.mxu1  ;;  %4005 = vmatmul.mubr.f32.gmra.mxu0 %v2303_v55 }
 0x42c   : > { %v2304_v54 = vsub.f32 %v2256_v51, %v3012_v3  ;;  %v2258_v16 = vadd.f32 %v2147_v44, %v4478_v37  ;;  %v3015_v49 = vclamps-f32 %v2259_v32, 0.01  ;;  %v5090_v3 = vld [vmem:[#allocation2_spill] sm:$0xff] }
 0x42d   : > { %v3903_v47 = vpop.f32.mrf.mxu1 }
 0x42e   : > { %v3014_v63 = vclamps-f32 %v2258_v16, 0.01  ;;  %v2261_v24 = vadd.f32 %v3903_v47, %v4485_v43  ;;  %4007 = vmatprep.mubr.f32.mxu1 %v2304_v54  ;;  %v2307_v50 = vsub.f32 %v2259_v32, %v3015_v49 }
 0x42f   : > { %v2157_v11 = vpop.f32.mrf.mxu1  ;;  %4008 = vmatmul.mubr.f32.vlgmr.msra.gmra.mxu1 %v2305_v53 }
 0x430   : > { %v2306_v4 = vsub.f32 %v2258_v16, %v3014_v63  ;;  %v2260_v5 = vadd.f32 %v2157_v11, %v4490_v46  ;;  %v3017_v23 = vclamps-f32 %v2261_v24, 0.01  ;;  %v5091_v16 = vld [vmem:[#allocation3_spill] sm:$0xff] }
 0x431   : > { %v3906_v42 = vpop.f32.mrf.mxu1 }
 0x432   : > { %v3016_v2 = vclamps-f32 %v2260_v5, 0.01  ;;  %v2263_v38 = vadd.f32 %v3906_v42, %v4497_v59  ;;  %4010 = vmatprep.mubr.f32.mxu1 %v2306_v4  ;;  %v2309_v57 = vsub.f32 %v2261_v24, %v3017_v23  ;;  %v5092_v24 = vld [vmem:[#allocation4_spill] sm:$0xff] }
 0x433   : > { %v2167_v31 = vpop.f32.mrf.mxu1  ;;  %4011 = vmatmul.mubr.f32.gmra.mxu1 %v2307_v50 }
 0x434   : > { %v2308_v18 = vsub.f32 %v2260_v5, %v3016_v2  ;;  %v2262_v15 = vadd.f32 %v2167_v31, %v4502_v0  ;;  %v3019_v1 = vclamps-f32 %v2263_v38, 0.01 }
 0x435   : > { %v3909_v12 = vpop.f32.mrf.mxu1 }
 0x436   : > { %v3018_v40 = vclamps-f32 %v2262_v15, 0.01  ;;  %v2265_v10 = vadd.f32 %v3909_v12, %v4509_v19  ;;  %4013 = vmatprep.mubr.f32.mxu1 %v2308_v18  ;;  %v2311_v36 = vsub.f32 %v2263_v38, %v3019_v1 }
 0x437   : > { %v2177_v6 = vpop.f32.mrf.mxu1  ;;  %4014 = vmatmul.mubr.f32.gmra.mxu1 %v2309_v57 }
 0x438   : > { %v2310_v48 = vsub.f32 %v2262_v15, %v3018_v40  ;;  %v2264_v20 = vadd.f32 %v2177_v6, %v4514_v26  ;;  %v3021_v22 = vclamps-f32 %v2265_v10, 0.01 }
 0x43a   : > { %v3020_v51 = vclamps-f32 %v2264_v20, 0.01  ;;  %4016 = vmatprep.mubr.f32.mxu1 %v2310_v48  ;;  %v2313_v30 = vsub.f32 %v2265_v10, %v3021_v22 }
 0x43b   : > { %4017 = vmatmul.mubr.f32.gmra.mxu1 %v2311_v36 }
 0x43c   : > { %v2312_v55 = vsub.f32 %v2264_v20, %v3020_v51 }
 0x43e   : > { %4019 = vmatprep.mubr.f32.mxu1 %v2312_v55 }
 0x43f   : > { %4020 = vmatmul.mubr.f32.gmra.mxu1 %v2313_v30 }
 0x4c3   : > { %v3944_v14 = vpop.f32.mrf.mxu0 }
 0x4c4   : > { %v2605_v32 = vadd.f32 %v3944_v14, %v5090_v3 }
 0x4c5   : > { %v2380_v44 = vpop.f32.mrf.mxu0 }
 0x4c6   : > { %v3023_v54 = vclamps-f32 %v2605_v32, 0.01  ;;  %v2604_v53 = vadd.f32 %v2380_v44, %v5091_v16 }
 0x4c7   : > { %v3947_v49 = vpop.f32.mrf.mxu0 }
 0x4c8   : > { %v2653_v47 = vsub.f32 %v2605_v32, %v3023_v54  ;;  %v3022_v63 = vclamps-f32 %v2604_v53, 0.01  ;;  %v2607_v11 = vadd.f32 %v3947_v49, %v5092_v24 }
 0x4c9   : > { %v2390_v4 = vpop.f32.mrf.mxu0 }
 0x4ca   : > { %2734 = vst.msk [vmem:[%s4969_s15 + $0x8] sm:$0xff] %vm2732_vm1, %v2653_v47  ;;  %v2652_v5 = vsub.f32 %v2604_v53, %v3022_v63  ;;  %v3025_v50 = vclamps-f32 %v2607_v11, 0.01  ;;  %v2606_v23 = vadd.f32 %v2390_v4, %v4349_v56 }
 0x4cb   : > { %v3950_v42 = vpop.f32.mrf.mxu0 }
 0x4cc   : > { %2733 = vst.msk [vmem:[%s4969_s15] sm:$0xff] %vm2732_vm1, %v2652_v5  ;;  %v2655_v2 = vsub.f32 %v2607_v11, %v3025_v50  ;;  %v3024_v38 = vclamps-f32 %v2606_v23, 0.01  ;;  %v2609_v31 = vadd.f32 %v3950_v42, %v4354_v60 }
 0x4cd   : > { %v2400_v18 = vpop.f32.mrf.mxu0 }
 0x4ce   : > { %2736 = vst.msk [vmem:[%s4969_s15 + $0x18] sm:$0xff] %vm2732_vm1, %v2655_v2  ;;  %v2654_v15 = vsub.f32 %v2606_v23, %v3024_v38  ;;  %v3027_v57 = vclamps-f32 %v2609_v31, 0.01  ;;  %v2608_v1 = vadd.f32 %v2400_v18, %v4359_v62 }
 0x4cf   : > { %v3953_v12 = vpop.f32.mrf.mxu0 }
 0x4d0   : > { %2735 = vst.msk [vmem:[%s4969_s15 + $0x10] sm:$0xff] %vm2732_vm1, %v2654_v15  ;;  %v2657_v56 = vsub.f32 %v2609_v31, %v3027_v57  ;;  %v3026_v40 = vclamps-f32 %v2608_v1, 0.01  ;;  %v2611_v10 = vadd.f32 %v3953_v12, %v4366_v7 }
 0x4d1   : > { %v2410_v6 = vpop.f32.mrf.mxu0 }
 0x4d2   : > { %2738 = vst.msk [vmem:[%s4969_s15 + $0x28] sm:$0xff] %vm2732_vm1, %v2657_v56  ;;  %v2656_v60 = vsub.f32 %v2608_v1, %v3026_v40  ;;  %v3029_v48 = vclamps-f32 %v2611_v10, 0.01  ;;  %v2610_v20 = vadd.f32 %v2410_v6, %v4371_v9 }
 0x4d3   : > { %v3956_v36 = vpop.f32.mrf.mxu0 }
 0x4d4   : > { %2737 = vst.msk [vmem:[%s4969_s15 + $0x20] sm:$0xff] %vm2732_vm1, %v2656_v60  ;;  %v2659_v62 = vsub.f32 %v2611_v10, %v3029_v48  ;;  %v3028_v22 = vclamps-f32 %v2610_v20, 0.01  ;;  %v2613_v51 = vadd.f32 %v3956_v36, %v4378_v17 }
 0x4d5   : > { %v2420_v55 = vpop.f32.mrf.mxu0 }
 0x4d6   : > { %2740 = vst.msk [vmem:[%s4969_s15 + $0x38] sm:$0xff] %vm2732_vm1, %v2659_v62  ;;  %v2658_v7 = vsub.f32 %v2610_v20, %v3028_v22  ;;  %v3031_v30 = vclamps-f32 %v2613_v51, 0.01  ;;  %v2612_v14 = vadd.f32 %v2420_v55, %v4383_v21 }
 0x4d7   : > { %v3959_v3 = vpop.f32.mrf.mxu0 }
 0x4d8   : > { %2739 = vst.msk [vmem:[%s4969_s15 + $0x30] sm:$0xff] %vm2732_vm1, %v2658_v7  ;;  %v2661_v9 = vsub.f32 %v2613_v51, %v3031_v30  ;;  %v3030_v32 = vclamps-f32 %v2612_v14, 0.01  ;;  %v2615_v44 = vadd.f32 %v3959_v3, %v4390_v27 }
 0x4d9   : > { %v2430_v54 = vpop.f32.mrf.mxu0 }
 0x4da   : > { %2742 = vst.msk [vmem:[%s4969_s15 + $0x48] sm:$0xff] %vm2732_vm1, %v2661_v9  ;;  %v2660_v17 = vsub.f32 %v2612_v14, %v3030_v32  ;;  %v3033_v16 = vclamps-f32 %v2615_v44, 0.01  ;;  %v2614_v53 = vadd.f32 %v2430_v54, %v4395_v29 }
 0x4db   : > { %v3962_v49 = vpop.f32.mrf.mxu0 }
 0x4dc   : > { %2741 = vst.msk [vmem:[%s4969_s15 + $0x40] sm:$0xff] %vm2732_vm1, %v2660_v17  ;;  %v2663_v21 = vsub.f32 %v2615_v44, %v3033_v16  ;;  %v3032_v47 = vclamps-f32 %v2614_v53, 0.01  ;;  %v2617_v63 = vadd.f32 %v3962_v49, %v4402_v33 }
 0x4dd   : > { %v2440_v24 = vpop.f32.mrf.mxu0 }
 0x4de   : > { %2744 = vst.msk [vmem:[%s4969_s15 + $0x58] sm:$0xff] %vm2732_vm1, %v2663_v21  ;;  %v2662_v27 = vsub.f32 %v2614_v53, %v3032_v47  ;;  %v3035_v11 = vclamps-f32 %v2617_v63, 0.01  ;;  %v2616_v4 = vadd.f32 %v2440_v24, %v4407_v35 }
 0x4df   : > { %v3965_v5 = vpop.f32.mrf.mxu0 }
 0x4e0   : > { %2743 = vst.msk [vmem:[%s4969_s15 + $0x50] sm:$0xff] %vm2732_vm1, %v2662_v27  ;;  %v2665_v29 = vsub.f32 %v2617_v63, %v3035_v11  ;;  %v3034_v50 = vclamps-f32 %v2616_v4, 0.01  ;;  %v2619_v23 = vadd.f32 %v3965_v5, %v4414_v39 }
 0x4e1   : > { %v2450_v42 = vpop.f32.mrf.mxu0 }
 0x4e2   : > { %2746 = vst.msk [vmem:[%s4969_s15 + $0x68] sm:$0xff] %vm2732_vm1, %v2665_v29  ;;  %v2664_v33 = vsub.f32 %v2616_v4, %v3034_v50  ;;  %v3037_v2 = vclamps-f32 %v2619_v23, 0.01  ;;  %v2618_v38 = vadd.f32 %v2450_v42, %v4419_v41 }
 0x4e3   : > { %v4000_v31 = vpop.f32.mrf.mxu0 }
 0x4e4   : > { %2745 = vst.msk [vmem:[%s4969_s15 + $0x60] sm:$0xff] %vm2732_vm1, %v2664_v33  ;;  %v2667_v35 = vsub.f32 %v2619_v23, %v3037_v2  ;;  %v3036_v18 = vclamps-f32 %v2618_v38, 0.01  ;;  %v2669_v15 = vadd.f32 %v4000_v31, %v4426_v45 }
 0x4e5   : > { %v2525_v57 = vpop.f32.mrf.mxu0 }
 0x4e6   : > { %2748 = vst.msk [vmem:[%s4969_s15 + $0x78] sm:$0xff] %vm2732_vm1, %v2667_v35  ;;  %v2666_v39 = vsub.f32 %v2618_v38, %v3036_v18  ;;  %v3039_v1 = vclamps-f32 %v2669_v15, 0.01  ;;  %v2668_v12 = vadd.f32 %v2525_v57, %v4431_v52 }
 0x4e7   : > { %v4003_v56 = vpop.f32.mrf.mxu0 }
 0x4e8   : > { %2747 = vst.msk [vmem:[%s4969_s15 + $0x70] sm:$0xff] %vm2732_vm1, %v2666_v39  ;;  %v2717_v41 = vsub.f32 %v2669_v15, %v3039_v1  ;;  %v3038_v40 = vclamps-f32 %v2668_v12, 0.01  ;;  %v2671_v10 = vadd.f32 %v4003_v56, %v4438_v58 }
 0x4e9   : > { %v2535_v6 = vpop.f32.mrf.mxu0 }
 0x4ea   : > { %2750 = vst.msk [vmem:[%s4969_s15 + $0x88] sm:$0xff] %vm2732_vm1, %v2717_v41  ;;  %v2716_v45 = vsub.f32 %v2668_v12, %v3038_v40  ;;  %v3041_v60 = vclamps-f32 %v2671_v10, 0.01  ;;  %v2670_v48 = vadd.f32 %v2535_v6, %v4443_v61 }
 0x4eb   : > { %v4006_v20 = vpop.f32.mrf.mxu0 }
 0x4ec   : > { %2749 = vst.msk [vmem:[%s4969_s15 + $0x80] sm:$0xff] %vm2732_vm1, %v2716_v45  ;;  %v2719_v52 = vsub.f32 %v2671_v10, %v3041_v60  ;;  %v3040_v36 = vclamps-f32 %v2670_v48, 0.01  ;;  %v2673_v62 = vadd.f32 %v4006_v20, %v4449_v8 }
 0x4ed   : > { %v2545_v22 = vpop.f32.mrf.mxu0 }
 0x4ee   : > { %2752 = vst.msk [vmem:[%s4969_s15 + $0x98] sm:$0xff] %vm2732_vm1, %v2719_v52  ;;  %v2718_v58 = vsub.f32 %v2670_v48, %v3040_v36  ;;  %v3043_v51 = vclamps-f32 %v2673_v62, 0.01  ;;  %v2672_v55 = vadd.f32 %v2545_v22, %v4454_v13 }
 0x4ef   : > { %v4009_v7 = vpop.f32.mrf.mxu1 }
 0x4f0   : > { %2751 = vst.msk [vmem:[%s4969_s15 + $0x90] sm:$0xff] %vm2732_vm1, %v2718_v58  ;;  %v2721_v61 = vsub.f32 %v2673_v62, %v3043_v51  ;;  %v3042_v30 = vclamps-f32 %v2672_v55, 0.01  ;;  %v2675_v14 = vadd.f32 %v4009_v7, %v4461_v25 }
 0x4f1   : > { %v2555_v3 = vpop.f32.mrf.mxu1 }
 0x4f2   : > { %2754 = vst.msk [vmem:[%s4969_s15 + $0xa8] sm:$0xff] %vm2732_vm1, %v2721_v61  ;;  %v2720_v8 = vsub.f32 %v2672_v55, %v3042_v30  ;;  %v3045_v9 = vclamps-f32 %v2675_v14, 0.01  ;;  %v2674_v32 = vadd.f32 %v2555_v3, %v4466_v28 }
 0x4f3   : > { %v4012_v44 = vpop.f32.mrf.mxu1 }
 0x4f4   : > { %2753 = vst.msk [vmem:[%s4969_s15 + $0xa0] sm:$0xff] %vm2732_vm1, %v2720_v8  ;;  %v2723_v13 = vsub.f32 %v2675_v14, %v3045_v9  ;;  %v3044_v54 = vclamps-f32 %v2674_v32, 0.01  ;;  %v2677_v17 = vadd.f32 %v4012_v44, %v4473_v34 }
 0x4f5   : > { %v2565_v16 = vpop.f32.mrf.mxu1 }
 0x4f6   : > { %2756 = vst.msk [vmem:[%s4969_s15 + $0xb8] sm:$0xff] %vm2732_vm1, %v2723_v13  ;;  %v2722_v25 = vsub.f32 %v2674_v32, %v3044_v54  ;;  %v3047_v53 = vclamps-f32 %v2677_v17, 0.01  ;;  %v2676_v49 = vadd.f32 %v2565_v16, %v4478_v37 }
 0x4f7   : > { %v4015_v21 = vpop.f32.mrf.mxu1 }
 0x4f8   : > { %2755 = vst.msk [vmem:[%s4969_s15 + $0xb0] sm:$0xff] %vm2732_vm1, %v2722_v25  ;;  %v2725_v28 = vsub.f32 %v2677_v17, %v3047_v53  ;;  %v3046_v47 = vclamps-f32 %v2676_v49, 0.01  ;;  %v2679_v63 = vadd.f32 %v4015_v21, %v4485_v43 }
 0x4f9   : > { %v2575_v24 = vpop.f32.mrf.mxu1 }
 0x4fa   : > { %2758 = vst.msk [vmem:[%s4969_s15 + $0xc8] sm:$0xff] %vm2732_vm1, %v2725_v28  ;;  %v2724_v34 = vsub.f32 %v2676_v49, %v3046_v47  ;;  %v3049_v27 = vclamps-f32 %v2679_v63, 0.01  ;;  %v2678_v11 = vadd.f32 %v2575_v24, %v4490_v46 }
 0x4fb   : > { %v4018_v4 = vpop.f32.mrf.mxu1 }
 0x4fc   : > { %2757 = vst.msk [vmem:[%s4969_s15 + $0xc0] sm:$0xff] %vm2732_vm1, %v2724_v34  ;;  %v2727_v37 = vsub.f32 %v2679_v63, %v3049_v27  ;;  %v3048_v5 = vclamps-f32 %v2678_v11, 0.01  ;;  %v2681_v29 = vadd.f32 %v4018_v4, %v4497_v59 }
 0x4fd   : > { %v2585_v50 = vpop.f32.mrf.mxu1 }
 0x4fe   : > { %2760 = vst.msk [vmem:[%s4969_s15 + $0xd8] sm:$0xff] %vm2732_vm1, %v2727_v37  ;;  %v2726_v43 = vsub.f32 %v2678_v11, %v3048_v5  ;;  %v3051_v23 = vclamps-f32 %v2681_v29, 0.01  ;;  %v2680_v42 = vadd.f32 %v2585_v50, %v4502_v0 }
 0x4ff   : > { %v4021_v33 = vpop.f32.mrf.mxu1 }
 0x500   : > { %2759 = vst.msk [vmem:[%s4969_s15 + $0xd0] sm:$0xff] %vm2732_vm1, %v2726_v43  ;;  %v2729_v46 = vsub.f32 %v2681_v29, %v3051_v23  ;;  %v3050_v2 = vclamps-f32 %v2680_v42, 0.01  ;;  %v2683_v38 = vadd.f32 %v4021_v33, %v4509_v19 }
 0x501   : > { %v2595_v31 = vpop.f32.mrf.mxu1 }
 0x502   : > { %2762 = vst.msk [vmem:[%s4969_s15 + $0xe8] sm:$0xff] %vm2732_vm1, %v2729_v46  ;;  %v2728_v59 = vsub.f32 %v2680_v42, %v3050_v2  ;;  %v3053_v35 = vclamps-f32 %v2683_v38, 0.01  ;;  %v2682_v18 = vadd.f32 %v2595_v31, %v4514_v26 }
 0x504   : > { %2761 = vst.msk [vmem:[%s4969_s15 + $0xe0] sm:$0xff] %vm2732_vm1, %v2728_v59  ;;  %v2731_v15 = vsub.f32 %v2683_v38, %v3053_v35  ;;  %v3052_v57 = vclamps-f32 %v2682_v18, 0.01 }
 0x506   : > { %2764 = vst.msk [vmem:[%s4969_s15 + $0xf8] sm:$0xff] %vm2732_vm1, %v2731_v15  ;;  %v2730_v0 = vsub.f32 %v2682_v18, %v3052_v57 }
 0x508   : > { %2763 = vst.msk [vmem:[%s4969_s15 + $0xf0] sm:$0xff] %vm2732_vm1, %v2730_v0 }
 0x509 PF: > { %s13_s12 = sadd.s32 1, %s4084_s12  }
 0x50a   : > { %p10_p4 = scmp.ge.s32.totalorder %s13_s12, 4  }
 0x50c   :  { %12 = sbr.rel (!%p10_p4) target bundleno = 1 (0x1), region = 62 }

</bundles_post_ra>
